<compile_context>
chip_gen: v7x
topology: tpu7x:2x2x1
jax: 0.10.0
libtpu: 0.0.40
codegen_flags: <defaults>
</compile_context>

<pallas_src>
import functools

import jax
import jax.numpy as jnp
from jax.experimental import pallas as pl
from jax.experimental.pallas import tpu as pltpu

NH = 512             # hidden width from the module (nh = 512)
LEAKY_SLOPE = 0.01   # nn.LeakyReLU default negative_slope
BN_EPS = 1e-5        # nn.BatchNorm2d default eps
TILE_N = 1024        # max rows per grid step (review: sweep 1024-2048; 1024 fits v5e)
LANE = 128           # output padded to a lane-dense multiple of 128 columns
SMALL_N = 256        # below this, a plain XLA matmul chain beats the Pallas launch
VMEM_LIMIT_BYTES = 48 * 1024 * 1024   # explicit scoped-VMEM headroom, <= v7x physical


def _round_up(x, m):
    return ((x + m - 1) // m) * m


def _layer(h_bf16, w, b):
    """bf16 matmul with f32 accumulation, f32 bias + LeakyReLU, back to bf16."""
    z = jnp.dot(h_bf16, w, preferred_element_type=jnp.float32) + b
    z = jnp.maximum(z, LEAKY_SLOPE * z)        # LeakyReLU (slope < 1)
    return z.astype(jnp.bfloat16)


def _disc_conv_kernel(x_ref, w1_ref, b1_ref, w2_ref, b2_ref, w3_ref, b3_ref,
                      w4_ref, b4_ref, o_ref, *, num_sub):
    """One (tile_n, nin) row tile -> sigmoid(L3(L2(L1(x))) @ W4 + b4), bf16 store.

    The tile is split into `num_sub` independent row sub-blocks whose layer chains are
    emitted in a single basic block, letting the LLO scheduler overlap one sub-block's
    VPU epilogue (bias + LeakyReLU + cast) with the other's MXU matmuls.
    """
    tile_n = x_ref.shape[0]
    sub_n = tile_n // num_sub

    w1, b1 = w1_ref[...], b1_ref[...]
    w2, b2 = w2_ref[...], b2_ref[...]
    w3, b3 = w3_ref[...], b3_ref[...]
    w4, b4 = w4_ref[...], b4_ref[...]

    for sb in range(num_sub):                  # static unroll
        rows = pl.ds(sb * sub_n, sub_n)
        h = _layer(x_ref[rows, :], w1, b1)
        h = _layer(h, w2, b2)
        h = _layer(h, w3, b3)
        z = jnp.dot(h, w4, preferred_element_type=jnp.float32) + b4
        o_ref[rows, :] = jax.nn.sigmoid(z).astype(o_ref.dtype)


@jax.jit
def _disc_conv_rows_pallas(x2d, w1, b1, w2, b2, w3, b3, w4, b4):
    """x2d: [N, nin] float32 -> [N, nout_pad] bfloat16 via the Pallas kernel."""
    n, nin = x2d.shape
    nout_pad = w4.shape[1]

    if n <= SMALL_N:
        # Single small tile; bf16 packs 2 rows per sublane -> round rows to 16.
        tile_n = _round_up(max(n, 1), 16)
    else:
        # MXU-sized tiles and always >= 2 grid steps so both v7x TensorCores get work
        # via dimension_semantics=("parallel",).
        tile_n = min(TILE_N, _round_up(pl.cdiv(n, 2), 256))
    num_sub = 2 if tile_n >= 512 else 1

    n_pad = _round_up(n, tile_n)
    x2d = jnp.pad(x2d.astype(jnp.bfloat16), ((0, n_pad - n), (0, 0)))

    const = lambda i: (0, 0)   # weights/biases stay VMEM-resident across grid steps
    # TODO(synk): grid-invariant operands could be single-buffered with
    # pipeline_mode=pl.Buffered(1) (~1.2 MB saved); left at default double-buffering
    # since total VMEM use (~10 MB at TILE_N=1024) is far below the 48 MB limit.
    # TODO(synk): padding nin (32) to 128 lanes is a possible low-single-digit-% win on
    # layer 1 (<5% of FLOPs); skipped pending measurement.

    out = pl.pallas_call(
        functools.partial(_disc_conv_kernel, num_sub=num_sub),
        out_shape=jax.ShapeDtypeStruct((n_pad, nout_pad), jnp.bfloat16),
        grid_spec=pltpu.PrefetchScalarGridSpec(
            num_scalar_prefetch=0,
            grid=(n_pad // tile_n,),
            in_specs=[
                pl.BlockSpec((tile_n, nin), lambda i: (i, 0)),   # x tile (bf16)
                pl.BlockSpec((nin, NH), const),                  # W1 (bf16, BN folded)
                pl.BlockSpec((1, NH), const),                    # b1 (f32)
                pl.BlockSpec((NH, NH), const),                   # W2
                pl.BlockSpec((1, NH), const),                    # b2
                pl.BlockSpec((NH, NH), const),                   # W3
                pl.BlockSpec((1, NH), const),                    # b3
                pl.BlockSpec((NH, nout_pad), const),             # W4 (padded to 128 cols)
                pl.BlockSpec((1, nout_pad), const),              # b4
            ],
            out_specs=pl.BlockSpec((tile_n, nout_pad), lambda i: (i, 0)),
        ),
        compiler_params=pltpu.CompilerParams(
            dimension_semantics=("parallel",),
            vmem_limit_bytes=VMEM_LIMIT_BYTES),
    )(x2d, w1, b1, w2, b2, w3, b3, w4, b4)

    return out[:n]


@jax.jit
def _disc_conv_rows_xla(x2d, w1, b1, w2, b2, w3, b3, w4, b4):
    """Small-N fast path / reference: identical math, plain XLA ops (no kernel launch)."""
    h = _layer(x2d.astype(jnp.bfloat16), w1, b1)
    h = _layer(h, w2, b2)
    h = _layer(h, w3, b3)
    z = jnp.dot(h, w4, preferred_element_type=jnp.float32) + b4
    return jax.nn.sigmoid(z).astype(jnp.bfloat16)


def init_disc_conv_params(key, nin, nout):
    """Deterministic parameter init matching the module's shapes, BN folded in.

    Conv2d(nin, nh, 1): weight (nh, nin, 1, 1) -> stored as (nin, nh) for x @ W.
    BatchNorm2d(nh):    gamma=1, beta=0, running_mean=0, running_var=1 (defaults),
                        folded into the conv weight/bias (inference semantics).
    Linear(nh, nout):   weight (nout, nh) -> stored as (nh, nout) and zero-padded to a
                        lane-dense 128-column slab; bias likewise.
    """
    ks = jax.random.split(key, 8)

    def uniform(k, shape, fan_in):
        bound = 1.0 / jnp.sqrt(jnp.float32(fan_in))
        return jax.random.uniform(k, shape, jnp.float32, -bound, bound)

    gamma = jnp.ones((NH,), jnp.float32)
    beta = jnp.zeros((NH,), jnp.float32)
    rmean = jnp.zeros((NH,), jnp.float32)
    rvar = jnp.ones((NH,), jnp.float32)
    scale = gamma / jnp.sqrt(rvar + BN_EPS)
    shift = beta - rmean * scale

    def fold(w, b):
        # (h@W + b)*scale + shift == h@(W*scale) + (b*scale + shift)
        w_eff = (w * scale[None, :]).astype(jnp.bfloat16)
        b_eff = (b * scale + shift).reshape(1, NH).astype(jnp.float32)
        return w_eff, b_eff

    w1, b1 = fold(uniform(ks[0], (nin, NH), nin), uniform(ks[1], (NH,), nin))
    w2, b2 = fold(uniform(ks[2], (NH, NH), NH), uniform(ks[3], (NH,), NH))
    w3, b3 = fold(uniform(ks[4], (NH, NH), NH), uniform(ks[5], (NH,), NH))

    nout_pad = _round_up(max(nout, 1), LANE)
    w4 = uniform(ks[6], (NH, nout), NH)
    b4 = uniform(ks[7], (nout,), NH)
    w4 = jnp.pad(w4, ((0, 0), (0, nout_pad - nout))).astype(jnp.bfloat16)
    b4 = jnp.pad(b4, (0, nout_pad - nout)).reshape(1, nout_pad).astype(jnp.float32)

    return (w1, b1, w2, b2, w3, b3, w4, b4)


def disc_conv_forward(x, params, nout, use_pallas=None):
    """Mirrors DiscConv.forward: accepts 3D (B, T, nz) or 4D (B, T, P, nz)."""
    lead = x.shape[:-1]
    rows = x.reshape(-1, x.shape[-1])
    if use_pallas is None:
        use_pallas = rows.shape[0] > SMALL_N   # tiny calls are weight-DMA/launch bound
    fn = _disc_conv_rows_pallas if use_pallas else _disc_conv_rows_xla
    out = fn(rows, *params)[:, :nout].astype(jnp.float32)
    return out.reshape(lead + (nout,))


def _reference_forward(x, params, nout):
    """Pure-JAX reference of the same (bf16-matmul, f32-accumulate, bf16-store) math."""
    rows = x.reshape(-1, x.shape[-1])
    out = _disc_conv_rows_xla(rows, *params)[:, :nout].astype(jnp.float32)
    return out.reshape(x.shape[:-1] + (nout,))


if __name__ == "__main__":
    key = jax.random.PRNGKey(0)
    k_x3, k_x4, k_p = jax.random.split(key, 3)

    nz, nout = 32, 1
    params = init_disc_conv_params(k_p, nin=nz, nout=nout)

    # Output is bf16-quantized (2^-8 resolution on [0,1]); tolerances account for that.
    ATOL, RTOL = 4e-3, 2e-3

    # 3D input (batch, frame, nz) = (2, 8, 32): 16 rows -> small-tile Pallas path.
    x3 = jax.random.normal(k_x3, (2, 8, nz), jnp.float32)
    out3 = jax.block_until_ready(disc_conv_forward(x3, params, nout, use_pallas=True))
    ref3 = _reference_forward(x3, params, nout)
    assert out3.shape == (2, 8, nout), out3.shape
    assert jnp.allclose(out3, ref3, atol=ATOL, rtol=RTOL), "3D Pallas mismatch"

    # 4D input (batch, frame, n_particle, nz) = (2, 8, 32, 32): 512 rows ->
    # multi-step Pallas grid (2 tiles of 256 rows; both v7x TensorCores busy).
    x4 = jax.random.normal(k_x4, (2, 8, 32, nz), jnp.float32)
    out4 = jax.block_until_ready(disc_conv_forward(x4, params, nout))
    ref4 = _reference_forward(x4, params, nout)
    assert out4.shape == (2, 8, 32, nout), out4.shape
    assert jnp.allclose(out4, ref4, atol=ATOL, rtol=RTOL), "4D Pallas mismatch"

    # Auto-dispatch small-N fast path (no Pallas launch) still matches.
    out3_fast = jax.block_until_ready(disc_conv_forward(x3, params, nout))
    assert jnp.allclose(out3_fast, ref3, atol=ATOL, rtol=RTOL), "fast-path mismatch"

    print("KERNEL_OK")
</pallas_src>

<mosaic_0001>
module attributes {stable_mosaic.version = 11 : i64} {
  func.func @_disc_conv_kernel(%arg0: i32, %arg1: memref<16x32xbf16, #tpu.memory_space<vmem>>, %arg2: memref<32x512xbf16, #tpu.memory_space<vmem>>, %arg3: memref<1x512xf32, #tpu.memory_space<vmem>>, %arg4: memref<512x512xbf16, #tpu.memory_space<vmem>>, %arg5: memref<1x512xf32, #tpu.memory_space<vmem>>, %arg6: memref<512x512xbf16, #tpu.memory_space<vmem>>, %arg7: memref<1x512xf32, #tpu.memory_space<vmem>>, %arg8: memref<512x128xbf16, #tpu.memory_space<vmem>>, %arg9: memref<1x128xf32, #tpu.memory_space<vmem>>, %arg10: memref<16x128xbf16, #tpu.memory_space<vmem>>) attributes {dimension_semantics = [#tpu.dimension_semantics<parallel>], iteration_bounds = array<i64: 1>, scalar_prefetch = 0 : i64, scratch_operands = 0 : i64, tpu.core_type = #tpu.core_type<tc>, window_params = [{transform_indices = @transform_0, window_bounds = array<i64: 16, 32>}, {pipeline_mode = #tpu.pipeline_mode<synchronous>, transform_indices = @transform_1, window_bounds = array<i64: 32, 512>}, {pipeline_mode = #tpu.pipeline_mode<synchronous>, transform_indices = @transform_2, window_bounds = array<i64: 1, 512>}, {pipeline_mode = #tpu.pipeline_mode<synchronous>, transform_indices = @transform_3, window_bounds = array<i64: 512, 512>}, {pipeline_mode = #tpu.pipeline_mode<synchronous>, transform_indices = @transform_4, window_bounds = array<i64: 1, 512>}, {pipeline_mode = #tpu.pipeline_mode<synchronous>, transform_indices = @transform_5, window_bounds = array<i64: 512, 512>}, {pipeline_mode = #tpu.pipeline_mode<synchronous>, transform_indices = @transform_6, window_bounds = array<i64: 1, 512>}, {pipeline_mode = #tpu.pipeline_mode<synchronous>, transform_indices = @transform_7, window_bounds = array<i64: 512, 128>}, {pipeline_mode = #tpu.pipeline_mode<synchronous>, transform_indices = @transform_8, window_bounds = array<i64: 1, 128>}, {transform_indices = @transform_9, window_bounds = array<i64: 16, 128>}]} {
    %c0 = arith.constant 0 : index
    %c0_0 = arith.constant 0 : index
    %0 = vector.load %arg2[%c0, %c0_0] : memref<32x512xbf16, #tpu.memory_space<vmem>>, vector<32x512xbf16>
    %c0_1 = arith.constant 0 : index
    %c0_2 = arith.constant 0 : index
    %1 = vector.load %arg3[%c0_1, %c0_2] : memref<1x512xf32, #tpu.memory_space<vmem>>, vector<1x512xf32>
    %c0_3 = arith.constant 0 : index
    %c0_4 = arith.constant 0 : index
    %2 = vector.load %arg4[%c0_3, %c0_4] : memref<512x512xbf16, #tpu.memory_space<vmem>>, vector<512x512xbf16>
    %c0_5 = arith.constant 0 : index
    %c0_6 = arith.constant 0 : index
    %3 = vector.load %arg5[%c0_5, %c0_6] : memref<1x512xf32, #tpu.memory_space<vmem>>, vector<1x512xf32>
    %c0_7 = arith.constant 0 : index
    %c0_8 = arith.constant 0 : index
    %4 = vector.load %arg6[%c0_7, %c0_8] : memref<512x512xbf16, #tpu.memory_space<vmem>>, vector<512x512xbf16>
    %c0_9 = arith.constant 0 : index
    %c0_10 = arith.constant 0 : index
    %5 = vector.load %arg7[%c0_9, %c0_10] : memref<1x512xf32, #tpu.memory_space<vmem>>, vector<1x512xf32>
    %c0_11 = arith.constant 0 : index
    %c0_12 = arith.constant 0 : index
    %6 = vector.load %arg8[%c0_11, %c0_12] : memref<512x128xbf16, #tpu.memory_space<vmem>>, vector<512x128xbf16>
    %c0_13 = arith.constant 0 : index
    %c0_14 = arith.constant 0 : index
    %7 = vector.load %arg9[%c0_13, %c0_14] : memref<1x128xf32, #tpu.memory_space<vmem>>, vector<1x128xf32>
    %c0_15 = arith.constant 0 : index
    %c0_16 = arith.constant 0 : index
    %8 = vector.load %arg1[%c0_15, %c0_16] : memref<16x32xbf16, #tpu.memory_space<vmem>>, vector<16x32xbf16>
    %cst = arith.constant dense<0.000000e+00> : vector<16x512xf32>
    %9 = tpu.matmul %8, %0, %cst {dimension_numbers = #tpu.dot_dimension_numbers<[1], [0], [0], [1], [0, 0, 1, 1], [], []>} : vector<16x32xbf16>, vector<32x512xbf16>, vector<16x512xf32> -> vector<16x512xf32>
    %10 = vector.broadcast %1 : vector<1x512xf32> to vector<16x512xf32>
    %11 = arith.addf %9, %10 : vector<16x512xf32>
    %cst_17 = arith.constant 0.00999999977 : f32
    %12 = vector.broadcast %cst_17 : f32 to vector<16x512xf32>
    %13 = arith.mulf %12, %11 : vector<16x512xf32>
    %14 = arith.maximumf %11, %13 : vector<16x512xf32>
    %15 = arith.truncf %14 : vector<16x512xf32> to vector<16x512xbf16>
    %cst_18 = arith.constant dense<0.000000e+00> : vector<16x512xf32>
    %16 = tpu.matmul %15, %2, %cst_18 {dimension_numbers = #tpu.dot_dimension_numbers<[1], [0], [0], [1], [0, 0, 1, 1], [], []>} : vector<16x512xbf16>, vector<512x512xbf16>, vector<16x512xf32> -> vector<16x512xf32>
    %17 = vector.broadcast %3 : vector<1x512xf32> to vector<16x512xf32>
    %18 = arith.addf %16, %17 : vector<16x512xf32>
    %cst_19 = arith.constant 0.00999999977 : f32
    %19 = vector.broadcast %cst_19 : f32 to vector<16x512xf32>
    %20 = arith.mulf %19, %18 : vector<16x512xf32>
    %21 = arith.maximumf %18, %20 : vector<16x512xf32>
    %22 = arith.truncf %21 : vector<16x512xf32> to vector<16x512xbf16>
    %cst_20 = arith.constant dense<0.000000e+00> : vector<16x512xf32>
    %23 = tpu.matmul %22, %4, %cst_20 {dimension_numbers = #tpu.dot_dimension_numbers<[1], [0], [0], [1], [0, 0, 1, 1], [], []>} : vector<16x512xbf16>, vector<512x512xbf16>, vector<16x512xf32> -> vector<16x512xf32>
    %24 = vector.broadcast %5 : vector<1x512xf32> to vector<16x512xf32>
    %25 = arith.addf %23, %24 : vector<16x512xf32>
    %cst_21 = arith.constant 0.00999999977 : f32
    %26 = vector.broadcast %cst_21 : f32 to vector<16x512xf32>
    %27 = arith.mulf %26, %25 : vector<16x512xf32>
    %28 = arith.maximumf %25, %27 : vector<16x512xf32>
    %29 = arith.truncf %28 : vector<16x512xf32> to vector<16x512xbf16>
    %cst_22 = arith.constant dense<0.000000e+00> : vector<16x128xf32>
    %30 = tpu.matmul %29, %6, %cst_22 {dimension_numbers = #tpu.dot_dimension_numbers<[1], [0], [0], [1], [0, 0, 1, 1], [], []>} : vector<16x512xbf16>, vector<512x128xbf16>, vector<16x128xf32> -> vector<16x128xf32>
    %31 = vector.broadcast %7 : vector<1x128xf32> to vector<16x128xf32>
    %32 = arith.addf %30, %31 : vector<16x128xf32>
    %33 = arith.negf %32 : vector<16x128xf32>
    %34 = math.exp %33 : vector<16x128xf32>
    %cst_23 = arith.constant 1.000000e+00 : f32
    %35 = vector.broadcast %cst_23 : f32 to vector<16x128xf32>
    %36 = arith.addf %35, %34 : vector<16x128xf32>
    %37 = arith.divf %35, %36 : vector<16x128xf32>
    %38 = arith.truncf %37 : vector<16x128xf32> to vector<16x128xbf16>
    %c0_24 = arith.constant 0 : index
    %c0_25 = arith.constant 0 : index
    %39 = vector.load %arg10[%c0_24, %c0_25] : memref<16x128xbf16, #tpu.memory_space<vmem>>, vector<16x128xbf16>
    tpu.vector_store %arg10[%c0_24, %c0_25], %38 {strides = array<i32>} : memref<16x128xbf16, #tpu.memory_space<vmem>>, vector<16x128xbf16>,
    return
  }
  func.func @transform_0(%arg0: i32) -> (i32, i32) {
    %c0_i32 = arith.constant 0 : i32
    %c0_i32_0 = arith.constant 0 : i32
    return %arg0, %c0_i32 : i32, i32
  }
  func.func @transform_1(%arg0: i32) -> (i32, i32) {
    %c0_i32 = arith.constant 0 : i32
    %c0_i32_0 = arith.constant 0 : i32
    %c0_i32_1 = arith.constant 0 : i32
    return %c0_i32, %c0_i32_0 : i32, i32
  }
  func.func @transform_2(%arg0: i32) -> (i32, i32) {
    %c0_i32 = arith.constant 0 : i32
    %c0_i32_0 = arith.constant 0 : i32
    %c0_i32_1 = arith.constant 0 : i32
    return %c0_i32, %c0_i32_0 : i32, i32
  }
  func.func @transform_3(%arg0: i32) -> (i32, i32) {
    %c0_i32 = arith.constant 0 : i32
    %c0_i32_0 = arith.constant 0 : i32
    %c0_i32_1 = arith.constant 0 : i32
    return %c0_i32, %c0_i32_0 : i32, i32
  }
  func.func @transform_4(%arg0: i32) -> (i32, i32) {
    %c0_i32 = arith.constant 0 : i32
    %c0_i32_0 = arith.constant 0 : i32
    %c0_i32_1 = arith.constant 0 : i32
    return %c0_i32, %c0_i32_0 : i32, i32
  }
  func.func @transform_5(%arg0: i32) -> (i32, i32) {
    %c0_i32 = arith.constant 0 : i32
    %c0_i32_0 = arith.constant 0 : i32
    %c0_i32_1 = arith.constant 0 : i32
    return %c0_i32, %c0_i32_0 : i32, i32
  }
  func.func @transform_6(%arg0: i32) -> (i32, i32) {
    %c0_i32 = arith.constant 0 : i32
    %c0_i32_0 = arith.constant 0 : i32
    %c0_i32_1 = arith.constant 0 : i32
    return %c0_i32, %c0_i32_0 : i32, i32
  }
  func.func @transform_7(%arg0: i32) -> (i32, i32) {
    %c0_i32 = arith.constant 0 : i32
    %c0_i32_0 = arith.constant 0 : i32
    %c0_i32_1 = arith.constant 0 : i32
    return %c0_i32, %c0_i32_0 : i32, i32
  }
  func.func @transform_8(%arg0: i32) -> (i32, i32) {
    %c0_i32 = arith.constant 0 : i32
    %c0_i32_0 = arith.constant 0 : i32
    %c0_i32_1 = arith.constant 0 : i32
    return %c0_i32, %c0_i32_0 : i32, i32
  }
  func.func @transform_9(%arg0: i32) -> (i32, i32) {
    %c0_i32 = arith.constant 0 : i32
    %c0_i32_0 = arith.constant 0 : i32
    return %arg0, %c0_i32 : i32, i32
  }
}

</mosaic_0001>

<bundles_post_ra>
// kernel: _disc_conv_rows_pallas.1
= control target key start
LH: loop header
LB: loop body
LE: loop exit
PB: predicated region body
PF: predicated region fallthrough
CT: control target
= control target key end

     0   :  { %14 = vsyncpa [#allocation3], 0  ;;  %s3772_s0 = inlined_call_operand.vmem [shape: bf16[16,32], index: 0, kind: input, shape index: {}]   ;;  %s3773_s1 = inlined_call_operand.hbm [shape: bf16[32,512], index: 1, kind: input, shape index: {}]   ;;  %s3774_s2 = inlined_call_operand.vmem [shape: f32[1,512], index: 2, kind: input, shape index: {}]   ;;  %s3775_s3 = inlined_call_operand.hbm [shape: bf16[512,512], index: 3, kind: input, shape index: {}]   ;;  %s3776_s4 = inlined_call_operand.vmem [shape: f32[1,512], index: 4, kind: input, shape index: {}]   ;;  %s3777_s5 = inlined_call_operand.hbm [shape: bf16[512,512], index: 5, kind: input, shape index: {}]   ;;  %s3778_s6 = inlined_call_operand.vmem [shape: f32[1,512], index: 6, kind: input, shape index: {}]   ;;  %s3779_s7 = inlined_call_operand.hbm [shape: bf16[512,128], index: 7, kind: input, shape index: {}]   ;;  %s3780_s8 = inlined_call_operand.vmem [shape: f32[1,128], index: 8, kind: input, shape index: {}]   ;;  %s3781_s9 = inlined_call_operand.hbm [shape: bf16[16,128], index: 9, kind: output, shape index: {}]  }
   0x1   :  { %15 = vsyncpa [#allocation6], 0 }
   0x2   :  { %16 = vsyncpa [#allocation9], 0 }
   0x3   :  { %17 = vsyncpa [#allocation4], 0  ;;  %s3578_s30 = smov [#allocation5]   ;;  %s3579_s11 = smov [#allocation2]  }
   0x4   :  { %s39_s10 = sshll.u32 %s3578_s30, 4  ;;  %s25_s12 = sshll.u32 %s3579_s11, 4  ;;  %s40_s10 = int_to_ptr.vmem [resolvable:$true] %s39_s10  ;;  %s3638_s12 = int_to_ptr.vmem [resolvable:$true] %s25_s12 }
   0x5   :  { %s3460_s15 = scalar_lea.hbm %s3775_s3, 16384 }
   0x6   :  { %p3461_p0 = scmp.ne.s32.totalorder %s3775_s3, %s3460_s15  ;;  %p3464_p1 = scmp.lt.u32.totalorder %s3460_s15, %s3775_s3 }
   0x8   :  { %p3466_p2 = pnand %p3464_p1, %p3461_p0 }
   0xa   :  { %3469 = shalt.err (!%p3466_p2)
}
   0xb   :  { %s3470_s20 = scalar_lea.vmem %s40_s10, 16384  ;;  %p3475_p4 = scmp.lt.s32.totalorder %s40_s10, %s40_s10 }
   0xc   :  { %p3471_p3 = scmp.ne.s32.totalorder %s40_s10, %s3470_s20  ;;  %p3476_p5 = scmp.lt.s32.totalorder %s3470_s20, %s3470_s20 }
   0xe   :  { %p3477_p6 = por %p3476_p5, %p3475_p4 }
  0x10   :  { %p3478_p7 = pnand %p3477_p6, %p3471_p3 }
  0x12   :  { %3481 = shalt.err (!%p3478_p7)
}
  0x13   :  { %s3580_s21 = smov 256   ;;  %s3581_s22 = smov 16  }
  0x14   :  { %45 = dma.hbm_to_vmem [thread:$0]  %s3775_s3, 16384, %s40_s10, [#allocation6], %s3580_s21, %s3580_s21, %s3581_s22  }
  0x15   :  { %s3482_s27 = scalar_lea.hbm %s3773_s1, 1024 }
  0x16   :  { %p3483_p8 = scmp.ne.s32.totalorder %s3773_s1, %s3482_s27  ;;  %p3486_p9 = scmp.lt.u32.totalorder %s3482_s27, %s3773_s1 }
  0x18   :  { %p3488_p10 = pnand %p3486_p9, %p3483_p8 }
  0x1a   :  { %3491 = shalt.err (!%p3488_p10)
}
  0x1b   :  { %s3492_s13 = scalar_lea.vmem %s3638_s12, 1024  ;;  %p3497_p12 = scmp.lt.s32.totalorder %s3638_s12, %s3638_s12 }
  0x1c   :  { %p3493_p11 = scmp.ne.s32.totalorder %s3638_s12, %s3492_s13  ;;  %p3498_p13 = scmp.lt.s32.totalorder %s3492_s13, %s3492_s13 }
  0x1e   :  { %p3499_p0 = por %p3498_p13, %p3497_p12 }
  0x20   :  { %p3500_p1 = pnand %p3499_p0, %p3493_p11 }
  0x22   :  { %3503 = shalt.err (!%p3500_p1)
}
  0x23   :  { %31 = dma.hbm_to_vmem [thread:$0]  %s3773_s1, 1024, %s3638_s12, [#allocation3], %s3580_s21, %s3580_s21, %s3581_s22  }
  0x24   :  { %s3582_s14 = smov [#allocation7]   ;;  %s3583_s16 = smov [#allocation8]  }
  0x25   :  { %s53_s15 = sshll.u32 %s3582_s14, 4  ;;  %s67_s17 = sshll.u32 %s3583_s16, 4  ;;  %s54_s15 = int_to_ptr.vmem [resolvable:$true] %s53_s15  ;;  %s3675_s17 = int_to_ptr.vmem [resolvable:$true] %s67_s17 }
  0x26   :  { %s3504_s20 = scalar_lea.hbm %s3777_s5, 16384 }
  0x27   :  { %p3505_p2 = scmp.ne.s32.totalorder %s3777_s5, %s3504_s20  ;;  %p3508_p3 = scmp.lt.u32.totalorder %s3504_s20, %s3777_s5 }
  0x29   :  { %p3510_p4 = pnand %p3508_p3, %p3505_p2 }
  0x2b   :  { %3513 = shalt.err (!%p3510_p4)
}
  0x2c   :  { %s3514_s1 = scalar_lea.vmem %s54_s15, 16384  ;;  %p3519_p6 = scmp.lt.s32.totalorder %s54_s15, %s54_s15 }
  0x2d   :  { %p3515_p5 = scmp.ne.s32.totalorder %s54_s15, %s3514_s1  ;;  %p3520_p7 = scmp.lt.s32.totalorder %s3514_s1, %s3514_s1 }
  0x2f   :  { %p3521_p8 = por %p3520_p7, %p3519_p6 }
  0x31   :  { %p3522_p9 = pnand %p3521_p8, %p3515_p5 }
  0x33   :  { %3525 = shalt.err (!%p3522_p9)
}
  0x34   :  { %59 = dma.hbm_to_vmem [thread:$0]  %s3777_s5, 16384, %s54_s15, [#allocation6], %s3580_s21, %s3580_s21, %s3581_s22  }
  0x35   :  { %s3526_s30 = scalar_lea.hbm %s3779_s7, 4096 }
  0x36   :  { %p3527_p10 = scmp.ne.s32.totalorder %s3779_s7, %s3526_s30  ;;  %p3530_p11 = scmp.lt.u32.totalorder %s3526_s30, %s3779_s7 }
  0x38   :  { %p3532_p12 = pnand %p3530_p11, %p3527_p10 }
  0x3a   :  { %3535 = shalt.err (!%p3532_p12)
}
  0x3b   :  { %s3536_s14 = scalar_lea.vmem %s3675_s17, 4096  ;;  %p3541_p0 = scmp.lt.s32.totalorder %s3675_s17, %s3675_s17 }
  0x3c   :  { %p3537_p13 = scmp.ne.s32.totalorder %s3675_s17, %s3536_s14  ;;  %p3542_p1 = scmp.lt.s32.totalorder %s3536_s14, %s3536_s14 }
  0x3e   :  { %p3543_p2 = por %p3542_p1, %p3541_p0 }
  0x40   :  { %p3544_p3 = pnand %p3543_p2, %p3537_p13 }
  0x42   :  { %3547 = shalt.err (!%p3544_p3)
}
  0x43   :  { %s3584_s5 = smov 64   ;;  %s3585_s21 = smov 4  }
  0x44   :  { %73 = dma.hbm_to_vmem [thread:$0]  %s3779_s7, 4096, %s3675_s17, [#allocation9], %s3584_s5, %s3584_s5, %s3585_s21  }
  0x45   :  { %3570 = dma.done.wait [#allocation3], 1024  }
  0x46   :  { %3571 = vsyncadd [#allocation3], 4294966272 }
  0x47   :  { %3572 = dma.done.wait [#allocation6], 32768  }
  0x48   :  { %3573 = vsyncadd [#allocation6], 4294934528 }
  0x49   :  { %3574 = dma.done.wait [#allocation9], 4096  }
  0x4a   :  { %3575 = vsyncadd [#allocation9], 4294963200  ;;  %v3586_v0 = vmov 0   ;;  %v3023_v1 = vld [vmem:[#allocation2 + $0x4] ss:$16 sps:$4 sm:$0xff]   ;;  %v3029_v5 = vld [vmem:[%s3772_s0] sm:$0xff]  }
  0x4b   :  { %525 = vmatprep.mubr.bf16.mxu0 %v3586_v0  ;;  %568 = vmatprep.mubr.bf16.mxu1 %v3586_v0  ;;  %v3025_v2 = vld [vmem:[#allocation2] ss:$16 sps:$4 sm:$0xff]   ;;  %v3026_v3 = vld [vmem:[#allocation2 + $0x24] ss:$16 sps:$4 sm:$0xff]   ;;  %v3030_v6 = vld [vmem:[#allocation2 + $0xc] ss:$16 sps:$4 sm:$0xff]  }
  0x4c   :  { %493 = vmatprep.subr.bf16.mxu0 %v3023_v1  ;;  %v3028_v4 = vld [vmem:[#allocation2 + $0x20] ss:$16 sps:$4 sm:$0xff]   ;;  %v3032_v7 = vld [vmem:[#allocation2 + $0x8] ss:$16 sps:$4 sm:$0xff]   ;;  %v3033_v8 = vld [vmem:[#allocation2 + $0x2c] ss:$16 sps:$4 sm:$0xff]   ;;  %536 = vmatprep.subr.bf16.mxu1 %v3030_v6 }
  0x4d   :  { %494 = vmatpush1.bf16.msra.mxu0 %v3025_v2  ;;  %v3035_v9 = vld [vmem:[#allocation2 + $0x28] ss:$16 sps:$4 sm:$0xff]   ;;  %vm489_vm0 = vcmask 261120   ;;  %537 = vmatpush1.bf16.msra.mxu1 %v3032_v7  ;;  %v3036_v10 = vld [vmem:[#allocation5] ss:$16 sps:$4 sm:$0xff]  }
  0x4e   :  { %495 = vmatprep.subr.bf16.mxu0 %v3026_v3  ;;  %v3038_v11 = vld [vmem:[#allocation5 + $0x4] ss:$16 sps:$4 sm:$0xff]   ;;  %538 = vmatprep.subr.bf16.mxu1 %v3033_v8  ;;  %v3041_v12 = vld [vmem:[#allocation5 + $0xc] ss:$16 sps:$4 sm:$0xff]   ;;  %v3039_v14 = vld [vmem:[#allocation5 + $0x8] ss:$16 sps:$4 sm:$0xff]  }
  0x4f   :  { %v3044_v13 = vld [vmem:[#allocation5 + $0x24] ss:$16 sps:$4 sm:$0xff]   ;;  %v3042_v15 = vld [vmem:[#allocation5 + $0x20] ss:$16 sps:$4 sm:$0xff]   ;;  %v3047_v16 = vld [vmem:[#allocation5 + $0x2c] ss:$16 sps:$4 sm:$0xff]  }
  0x50   :  { %v3050_v17 = vld [vmem:[#allocation5 + $0x44] ss:$16 sps:$4 sm:$0xff]   ;;  %v3045_v18 = vld [vmem:[#allocation5 + $0x28] ss:$16 sps:$4 sm:$0xff]   ;;  %v3048_v19 = vld [vmem:[#allocation5 + $0x40] ss:$16 sps:$4 sm:$0xff]  }
  0x51   :  { %496 = vmatpush1.bf16.msra.mxu0 %v3028_v4  ;;  %539 = vmatpush1.bf16.msra.mxu1 %v3035_v9  ;;  %v3053_v20 = vld [vmem:[#allocation5 + $0x4c] ss:$16 sps:$4 sm:$0xff]   ;;  %v3056_v21 = vld [vmem:[#allocation5 + $0x64] ss:$16 sps:$4 sm:$0xff]   ;;  %v3051_v22 = vld [vmem:[#allocation5 + $0x48] ss:$16 sps:$4 sm:$0xff]  }
  0x52   :  { %1260 = vmatprep.subr.bf16.mxu0 %v3038_v11  ;;  %1346 = vmatprep.subr.bf16.mxu1 %v3041_v12  ;;  %v3054_v23 = vld [vmem:[#allocation5 + $0x60] ss:$16 sps:$4 sm:$0xff]   ;;  %v3059_v24 = vld [vmem:[#allocation5 + $0x6c] ss:$16 sps:$4 sm:$0xff]   ;;  %v3062_v25 = vld [vmem:[#allocation5 + $0x84] ss:$16 sps:$4 sm:$0xff]   ;;  %v424_v12 = vlaneseq }
  0x53   :  { %v3057_v26 = vld [vmem:[#allocation5 + $0x68] ss:$16 sps:$4 sm:$0xff]   ;;  %v3060_v27 = vld [vmem:[#allocation5 + $0x80] ss:$16 sps:$4 sm:$0xff]   ;;  %v3065_v28 = vld [vmem:[#allocation5 + $0x8c] ss:$16 sps:$4 sm:$0xff]  }
  0x54   :  { %2635 = vmatmul.mubr.msk.bf16.vlgmr.msra.gmra.mrb[0].mxu0 %vm489_vm0, %v3029_v5  ;;  %2636 = vmatmul.mubr.msk.bf16.vlgmr.msra.gmra.mrb[0].mxu1 %vm489_vm0, %v3029_v5  ;;  %v3068_v29 = vld [vmem:[#allocation5 + $0xa4] ss:$16 sps:$4 sm:$0xff]   ;;  %v3063_v30 = vld [vmem:[#allocation5 + $0x88] ss:$16 sps:$4 sm:$0xff]   ;;  %v3066_v31 = vld [vmem:[#allocation5 + $0xa0] ss:$16 sps:$4 sm:$0xff]  }
  0x55   :  { %1261 = vmatpush1.bf16.msra.mxu0 %v3036_v10  ;;  %1347 = vmatpush1.bf16.msra.mxu1 %v3039_v14  ;;  %v3071_v32 = vld [vmem:[#allocation5 + $0xac] ss:$16 sps:$4 sm:$0xff]   ;;  %v3074_v33 = vld [vmem:[#allocation5 + $0xc4] ss:$16 sps:$4 sm:$0xff]   ;;  %v3069_v34 = vld [vmem:[#allocation5 + $0xa8] ss:$16 sps:$4 sm:$0xff]  }
  0x56   :  { %1262 = vmatprep.subr.bf16.mxu0 %v3044_v13  ;;  %1348 = vmatprep.subr.bf16.mxu1 %v3047_v16  ;;  %v3072_v35 = vld [vmem:[#allocation5 + $0xc0] ss:$16 sps:$4 sm:$0xff]   ;;  %v3077_v36 = vld [vmem:[#allocation5 + $0xcc] ss:$16 sps:$4 sm:$0xff]   ;;  %v3080_v37 = vld [vmem:[#allocation5 + $0xe4] ss:$16 sps:$4 sm:$0xff]  }
  0x57   :  { %v3075_v38 = vld [vmem:[#allocation5 + $0xc8] ss:$16 sps:$4 sm:$0xff]   ;;  %v3078_v39 = vld [vmem:[#allocation5 + $0xe0] ss:$16 sps:$4 sm:$0xff]   ;;  %v3083_v40 = vld [vmem:[#allocation5 + $0xec] ss:$16 sps:$4 sm:$0xff]  }
  0x58   :  { %v3086_v41 = vld [vmem:[#allocation5 + $0x104] ss:$16 sps:$4 sm:$0xff]   ;;  %v3081_v42 = vld [vmem:[#allocation5 + $0xe8] ss:$16 sps:$4 sm:$0xff]   ;;  %v3084_v43 = vld [vmem:[#allocation5 + $0x100] ss:$16 sps:$4 sm:$0xff]  }
  0x59   :  { %1263 = vmatpush1.bf16.msra.mxu0 %v3042_v15  ;;  %1349 = vmatpush1.bf16.msra.mxu1 %v3045_v18  ;;  %v3089_v44 = vld [vmem:[#allocation5 + $0x10c] ss:$16 sps:$4 sm:$0xff]   ;;  %v3092_v45 = vld [vmem:[#allocation5 + $0x124] ss:$16 sps:$4 sm:$0xff]   ;;  %v3087_v46 = vld [vmem:[#allocation5 + $0x108] ss:$16 sps:$4 sm:$0xff]  }
  0x5a   :  { %1264 = vmatprep.subr.bf16.mxu0 %v3050_v17  ;;  %1350 = vmatprep.subr.bf16.mxu1 %v3053_v20  ;;  %v3090_v47 = vld [vmem:[#allocation5 + $0x120] ss:$16 sps:$4 sm:$0xff]   ;;  %v3095_v48 = vld [vmem:[#allocation5 + $0x12c] ss:$16 sps:$4 sm:$0xff]   ;;  %v3098_v49 = vld [vmem:[#allocation5 + $0x144] ss:$16 sps:$4 sm:$0xff]  }
  0x5b   :  { %v3093_v50 = vld [vmem:[#allocation5 + $0x128] ss:$16 sps:$4 sm:$0xff]   ;;  %v3096_v51 = vld [vmem:[#allocation5 + $0x140] ss:$16 sps:$4 sm:$0xff]   ;;  %v3101_v52 = vld [vmem:[#allocation5 + $0x14c] ss:$16 sps:$4 sm:$0xff]  }
  0x5c   :  { %v3104_v53 = vld [vmem:[#allocation5 + $0x164] ss:$16 sps:$4 sm:$0xff]   ;;  %v3099_v54 = vld [vmem:[#allocation5 + $0x148] ss:$16 sps:$4 sm:$0xff]   ;;  %v3102_v55 = vld [vmem:[#allocation5 + $0x160] ss:$16 sps:$4 sm:$0xff]  }
  0x5d   :  { %1265 = vmatpush1.bf16.msra.mxu0 %v3048_v19  ;;  %1351 = vmatpush1.bf16.msra.mxu1 %v3051_v22  ;;  %v3107_v56 = vld [vmem:[#allocation5 + $0x16c] ss:$16 sps:$4 sm:$0xff]   ;;  %v3110_v57 = vld [vmem:[#allocation5 + $0x184] ss:$16 sps:$4 sm:$0xff]   ;;  %v3105_v58 = vld [vmem:[#allocation5 + $0x168] ss:$16 sps:$4 sm:$0xff]  }
  0x5e   :  { %1266 = vmatprep.subr.bf16.mxu0 %v3056_v21  ;;  %1352 = vmatprep.subr.bf16.mxu1 %v3059_v24  ;;  %v3108_v59 = vld [vmem:[#allocation5 + $0x180] ss:$16 sps:$4 sm:$0xff]   ;;  %v3113_v60 = vld [vmem:[#allocation5 + $0x18c] ss:$16 sps:$4 sm:$0xff]   ;;  %v3111_v61 = vld [vmem:[#allocation5 + $0x188] ss:$16 sps:$4 sm:$0xff]  }
  0x5f   :  { %v3116_v62 = vld [vmem:[#allocation5 + $0x1a4] ss:$16 sps:$4 sm:$0xff]   ;;  %v3119_v63 = vld [vmem:[#allocation5 + $0x1ac] ss:$16 sps:$4 sm:$0xff]   ;;  %v3114_v0 = vld [vmem:[#allocation5 + $0x1a0] ss:$16 sps:$4 sm:$0xff]  }
  0x60   :  { %v3117_v1 = vld [vmem:[#allocation5 + $0x1a8] ss:$16 sps:$4 sm:$0xff]   ;;  %v3122_v2 = vld [vmem:[#allocation5 + $0x1c4] ss:$16 sps:$4 sm:$0xff]   ;;  %v3125_v3 = vld [vmem:[#allocation5 + $0x1cc] ss:$16 sps:$4 sm:$0xff]  }
  0x61   :  { %1267 = vmatpush1.bf16.msra.mxu0 %v3054_v23  ;;  %1353 = vmatpush1.bf16.msra.mxu1 %v3057_v26  ;;  %v3120_v4 = vld [vmem:[#allocation5 + $0x1c0] ss:$16 sps:$4 sm:$0xff]   ;;  %v3123_v5 = vld [vmem:[#allocation5 + $0x1c8] ss:$16 sps:$4 sm:$0xff]   ;;  %v3128_v6 = vld [vmem:[#allocation5 + $0x1e4] ss:$16 sps:$4 sm:$0xff]  }
  0x62   :  { %1268 = vmatprep.subr.bf16.mxu0 %v3062_v25  ;;  %1354 = vmatprep.subr.bf16.mxu1 %v3065_v28  ;;  %v3131_v7 = vld [vmem:[#allocation5 + $0x1ec] ss:$16 sps:$4 sm:$0xff]   ;;  %v3126_v8 = vld [vmem:[#allocation5 + $0x1e0] ss:$16 sps:$4 sm:$0xff]   ;;  %v3129_v9 = vld [vmem:[#allocation5 + $0x1e8] ss:$16 sps:$4 sm:$0xff]  }
  0x63   :  { %v3134_v10 = vld [vmem:[#allocation5 + $0x204] ss:$16 sps:$4 sm:$0xff]   ;;  %v3137_v11 = vld [vmem:[#allocation5 + $0x20c] ss:$16 sps:$4 sm:$0xff]   ;;  %v425_v13 = vshrl.u32 %v424_v12, 7 }
  0x64   :  { %v97_v15 = vld [vmem:[%s3774_s2] sm:$0xf] }
  0x65   :  { %1269 = vmatpush1.bf16.msra.mxu0 %v3060_v27  ;;  %1355 = vmatpush1.bf16.msra.mxu1 %v3063_v30  ;;  %v3717_v14 = vsub.s32 0, %v425_v13  ;;  %v3722_v16 = vsub.s32 1, %v425_v13  ;;  %v3725_v18 = vsub.s32 2, %v425_v13  ;;  %v3728_v20 = vsub.s32 3, %v425_v13  ;;  %v3159_v12 = vld [vmem:[#allocation5 + $0x288] ss:$16 sps:$4 sm:$0xff]  }
  0x66   :  { %1270 = vmatprep.subr.bf16.mxu0 %v3068_v29  ;;  %1356 = vmatprep.subr.bf16.mxu1 %v3071_v32  ;;  %v3164_v13 = vld [vmem:[#allocation5 + $0x2a4] ss:$16 sps:$4 sm:$0xff]  }
  0x67   :  { %v427_v17 = vrot.slane %v97_v15, %v3717_v14  ;;  %v431_v19 = vrot.slane %v97_v15, %v3722_v16  ;;  %v435_v24 = vrot.slane %v97_v15, %v3725_v18  ;;  %v439_v27 = vrot.slane %v97_v15, %v3728_v20  ;;  %v3167_v15 = vld [vmem:[#allocation5 + $0x2ac] ss:$16 sps:$4 sm:$0xff]  }
  0x69   :  { %1271 = vmatpush1.bf16.msra.mxu0 %v3066_v31  ;;  %1357 = vmatpush1.bf16.msra.mxu1 %v3069_v34 }
  0x6a   :  { %1272 = vmatprep.subr.bf16.mxu0 %v3074_v33  ;;  %1358 = vmatprep.subr.bf16.mxu1 %v3077_v36 }
  0x6d   :  { %1273 = vmatpush1.bf16.msra.mxu0 %v3072_v35  ;;  %1359 = vmatpush1.bf16.msra.mxu1 %v3075_v38 }
  0x6e   :  { %1274 = vmatprep.subr.bf16.mxu0 %v3080_v37  ;;  %1360 = vmatprep.subr.bf16.mxu1 %v3083_v40 }
  0x71   :  { %1275 = vmatpush1.bf16.msra.mxu0 %v3078_v39  ;;  %1361 = vmatpush1.bf16.msra.mxu1 %v3081_v42 }
  0x72   :  { %1276 = vmatprep.subr.bf16.mxu0 %v3086_v41  ;;  %1362 = vmatprep.subr.bf16.mxu1 %v3089_v44 }
  0x75   :  { %1277 = vmatpush1.bf16.msra.mxu0 %v3084_v43  ;;  %1363 = vmatpush1.bf16.msra.mxu1 %v3087_v46 }
  0x76   :  { %1278 = vmatprep.subr.bf16.mxu0 %v3092_v45  ;;  %1364 = vmatprep.subr.bf16.mxu1 %v3095_v48 }
  0x79   :  { %1279 = vmatpush1.bf16.msra.mxu0 %v3090_v47  ;;  %1365 = vmatpush1.bf16.msra.mxu1 %v3093_v50 }
  0x7a   :  { %1280 = vmatprep.subr.bf16.mxu0 %v3098_v49  ;;  %1366 = vmatprep.subr.bf16.mxu1 %v3101_v52 }
  0x7d   :  { %1281 = vmatpush1.bf16.msra.mxu0 %v3096_v51  ;;  %1367 = vmatpush1.bf16.msra.mxu1 %v3099_v54  ;;  %v3135_v54 = vld [vmem:[#allocation5 + $0x208] ss:$16 sps:$4 sm:$0xff]  }
  0x7e   :  { %1282 = vmatprep.subr.bf16.mxu0 %v3104_v53  ;;  %1368 = vmatprep.subr.bf16.mxu1 %v3107_v56  ;;  %v3132_v53 = vld [vmem:[#allocation5 + $0x200] ss:$16 sps:$4 sm:$0xff]  }
  0x81   :  { %1283 = vmatpush1.bf16.msra.mxu0 %v3102_v55  ;;  %1369 = vmatpush1.bf16.msra.mxu1 %v3105_v58  ;;  %v3143_v58 = vld [vmem:[#allocation5 + $0x22c] ss:$16 sps:$4 sm:$0xff]  }
  0x82   :  { %1284 = vmatprep.subr.bf16.mxu0 %v3110_v57  ;;  %1370 = vmatprep.subr.bf16.mxu1 %v3113_v60  ;;  %v3140_v57 = vld [vmem:[#allocation5 + $0x224] ss:$16 sps:$4 sm:$0xff]  }
  0x85   :  { %1285 = vmatpush1.bf16.msra.mxu0 %v3108_v59  ;;  %1371 = vmatpush1.bf16.msra.mxu1 %v3111_v61 }
  0x86   :  { %1286 = vmatprep.subr.bf16.mxu0 %v3116_v62  ;;  %1372 = vmatprep.subr.bf16.mxu1 %v3119_v63  ;;  %v3138_v62 = vld [vmem:[#allocation5 + $0x220] ss:$16 sps:$4 sm:$0xff]   ;;  %v3141_v63 = vld [vmem:[#allocation5 + $0x228] ss:$16 sps:$4 sm:$0xff]  }
  0x89   :  { %1287 = vmatpush1.bf16.msra.mxu0 %v3114_v0  ;;  %1373 = vmatpush1.bf16.msra.mxu1 %v3117_v1  ;;  %v3146_v1 = vld [vmem:[#allocation5 + $0x244] ss:$16 sps:$4 sm:$0xff]  }
  0x8a   :  { %1288 = vmatprep.subr.bf16.mxu0 %v3122_v2  ;;  %1374 = vmatprep.subr.bf16.mxu1 %v3125_v3  ;;  %v3149_v2 = vld [vmem:[#allocation5 + $0x24c] ss:$16 sps:$4 sm:$0xff]   ;;  %v3144_v3 = vld [vmem:[#allocation5 + $0x240] ss:$16 sps:$4 sm:$0xff]  }
  0x8d   :  { %1289 = vmatpush1.bf16.msra.mxu0 %v3120_v4  ;;  %1375 = vmatpush1.bf16.msra.mxu1 %v3123_v5  ;;  %v3147_v4 = vld [vmem:[#allocation5 + $0x248] ss:$16 sps:$4 sm:$0xff]   ;;  %v3152_v5 = vld [vmem:[#allocation5 + $0x264] ss:$16 sps:$4 sm:$0xff]  }
  0x8e   :  { %1290 = vmatprep.subr.bf16.mxu0 %v3128_v6  ;;  %1376 = vmatprep.subr.bf16.mxu1 %v3131_v7  ;;  %v3155_v6 = vld [vmem:[#allocation5 + $0x26c] ss:$16 sps:$4 sm:$0xff]   ;;  %v3150_v7 = vld [vmem:[#allocation5 + $0x260] ss:$16 sps:$4 sm:$0xff]  }
  0x91   :  { %1291 = vmatpush1.bf16.msra.mxu0 %v3126_v8  ;;  %1377 = vmatpush1.bf16.msra.mxu1 %v3129_v9  ;;  %v3153_v8 = vld [vmem:[#allocation5 + $0x268] ss:$16 sps:$4 sm:$0xff]   ;;  %v3158_v9 = vld [vmem:[#allocation5 + $0x284] ss:$16 sps:$4 sm:$0xff]  }
  0x92   :  { %1303 = vmatprep.subr.bf16.mxu0 %v3134_v10  ;;  %1389 = vmatprep.subr.bf16.mxu1 %v3137_v11  ;;  %v3161_v10 = vld [vmem:[#allocation5 + $0x28c] ss:$16 sps:$4 sm:$0xff]   ;;  %v3156_v11 = vld [vmem:[#allocation5 + $0x280] ss:$16 sps:$4 sm:$0xff]  }
 0x127   :  { %v527_v21 = vpop.f32.mrb[0].mxu0  ;;  %v570_v33 = vpop.f32.mrb[0].mxu1 }
 0x128   :  { %v528_v22 = vadd.f32 %v527_v21, %v427_v17  ;;  %v529_v23 = vpop.f32.mrb[1].mxu0  ;;  %v571_v35 = vadd.f32 %v570_v33, %v435_v24  ;;  %v572_v36 = vpop.f32.mrb[1].mxu1  ;;  %v3170_v21 = vld [vmem:[#allocation5 + $0x2c4] ss:$16 sps:$4 sm:$0xff]  }
 0x129   :  { %v530_v25 = vadd.f32 %v529_v23, %v431_v19  ;;  %v531_v26 = vpop.f32.mrb[2].mxu0  ;;  %v573_v38 = vadd.f32 %v572_v36, %v439_v27  ;;  %v574_v39 = vpop.f32.mrb[2].mxu1  ;;  %v3168_v23 = vld [vmem:[#allocation5 + $0x2c0] ss:$16 sps:$4 sm:$0xff]   ;;  %v3188_v33 = vld [vmem:[#allocation5 + $0x324] ss:$16 sps:$4 sm:$0xff]  }
 0x12a   :  { %v579_v28 = vmul.f32 0.01, %v528_v22  ;;  %v532_v29 = vadd.f32 %v531_v26, %v427_v17  ;;  %v533_v30 = vpop.f32.mrb[3].mxu0  ;;  %v581_v42 = vmul.f32 0.01, %v571_v35  ;;  %v575_v43 = vadd.f32 %v574_v39, %v435_v24  ;;  %v576_v44 = vpop.f32.mrb[3].mxu1 }
 0x12b   :  { %v580_v31 = vmul.f32 0.01, %v530_v25  ;;  %v534_v32 = vadd.f32 %v533_v30, %v431_v19  ;;  %v582_v47 = vmul.f32 0.01, %v573_v38  ;;  %v577_v48 = vadd.f32 %v576_v44, %v439_v27  ;;  %v3162_v17 = vld [vmem:[#allocation5 + $0x2a0] ss:$16 sps:$4 sm:$0xff]  }
 0x12c   :  { %v583_v34 = vmul.f32 0.01, %v532_v29  ;;  %v587_v40 = vmax.f32 %v528_v22, %v579_v28  ;;  %v589_v50 = vmax.f32 %v571_v35, %v581_v42  ;;  %v585_v51 = vmul.f32 0.01, %v575_v43  ;;  %v3165_v19 = vld [vmem:[#allocation5 + $0x2a8] ss:$16 sps:$4 sm:$0xff]  }
 0x12d   :  { %v584_v37 = vmul.f32 0.01, %v534_v32  ;;  %v588_v45 = vmax.f32 %v530_v25, %v580_v31  ;;  %v590_v55 = vmax.f32 %v573_v38, %v582_v47  ;;  %v586_v56 = vmul.f32 0.01, %v577_v48  ;;  %v3173_v22 = vld [vmem:[#allocation5 + $0x2cc] ss:$16 sps:$4 sm:$0xff]  }
 0x12e   :  { %v591_v41 = vmax.f32 %v532_v29, %v583_v34  ;;  %v593_v59 = vmax.f32 %v575_v43, %v585_v51  ;;  %v3171_v24 = vld [vmem:[#allocation5 + $0x2c8] ss:$16 sps:$4 sm:$0xff]   ;;  %v3176_v25 = vld [vmem:[#allocation5 + $0x2e4] ss:$16 sps:$4 sm:$0xff]   ;;  %v3179_v26 = vld [vmem:[#allocation5 + $0x2ec] ss:$16 sps:$4 sm:$0xff]  }
 0x12f   :  { %v592_v46 = vmax.f32 %v534_v32, %v584_v37  ;;  %v594_v60 = vmax.f32 %v577_v48, %v586_v56  ;;  %v3174_v27 = vld [vmem:[#allocation5 + $0x2e0] ss:$16 sps:$4 sm:$0xff]   ;;  %v3177_v28 = vld [vmem:[#allocation5 + $0x2e8] ss:$16 sps:$4 sm:$0xff]   ;;  %v3182_v29 = vld [vmem:[#allocation5 + $0x304] ss:$16 sps:$4 sm:$0xff]  }
 0x130   :  { %v595_v49 = vpack.c.bf16 %v591_v41, %v587_v40  ;;  %v3732_v61 = vpack.c.bf16 %v593_v59, %v589_v50  ;;  %v3185_v30 = vld [vmem:[#allocation5 + $0x30c] ss:$16 sps:$4 sm:$0xff]   ;;  %v3180_v31 = vld [vmem:[#allocation5 + $0x300] ss:$16 sps:$4 sm:$0xff]   ;;  %v3183_v32 = vld [vmem:[#allocation5 + $0x308] ss:$16 sps:$4 sm:$0xff]  }
 0x131   :  { %v596_v52 = vpack.c.bf16 %v592_v46, %v588_v45  ;;  %v598_v0 = vpack.c.bf16 %v594_v60, %v590_v55  ;;  %v3191_v34 = vld [vmem:[#allocation5 + $0x32c] ss:$16 sps:$4 sm:$0xff]   ;;  %v3186_v35 = vld [vmem:[#allocation5 + $0x320] ss:$16 sps:$4 sm:$0xff]   ;;  %v3189_v36 = vld [vmem:[#allocation5 + $0x328] ss:$16 sps:$4 sm:$0xff]  }
 0x132   :  { %v3194_v37 = vld [vmem:[#allocation5 + $0x344] ss:$16 sps:$4 sm:$0xff]   ;;  %v3197_v38 = vld [vmem:[#allocation5 + $0x34c] ss:$16 sps:$4 sm:$0xff]   ;;  %v3192_v39 = vld [vmem:[#allocation5 + $0x340] ss:$16 sps:$4 sm:$0xff]  }
 0x133   :  { %1292 = vmatprep.mubr.bf16.mxu0 %v596_v52  ;;  %1378 = vmatprep.mubr.bf16.mxu1 %v596_v52  ;;  %v3195_v40 = vld [vmem:[#allocation5 + $0x348] ss:$16 sps:$4 sm:$0xff]   ;;  %v3200_v41 = vld [vmem:[#allocation5 + $0x364] ss:$16 sps:$4 sm:$0xff]   ;;  %v3203_v42 = vld [vmem:[#allocation5 + $0x36c] ss:$16 sps:$4 sm:$0xff]  }
 0x134   :  { %1293 = vmatmul.mubr.bf16.vlgmr.msra.gmra.mrb[4].mxu0 %v595_v49  ;;  %1379 = vmatmul.mubr.bf16.vlgmr.msra.gmra.mrb[4].mxu1 %v595_v49  ;;  %v3198_v43 = vld [vmem:[#allocation5 + $0x360] ss:$16 sps:$4 sm:$0xff]   ;;  %v3201_v44 = vld [vmem:[#allocation5 + $0x368] ss:$16 sps:$4 sm:$0xff]   ;;  %v3206_v45 = vld [vmem:[#allocation5 + $0x384] ss:$16 sps:$4 sm:$0xff]  }
 0x135   :  { %1304 = vmatpush1.bf16.msra.mxu0 %v3132_v53  ;;  %1390 = vmatpush1.bf16.msra.mxu1 %v3135_v54  ;;  %v3209_v46 = vld [vmem:[#allocation5 + $0x38c] ss:$16 sps:$4 sm:$0xff]   ;;  %v3204_v47 = vld [vmem:[#allocation5 + $0x380] ss:$16 sps:$4 sm:$0xff]   ;;  %v3207_v48 = vld [vmem:[#allocation5 + $0x388] ss:$16 sps:$4 sm:$0xff]  }
 0x136   :  { %1305 = vmatprep.subr.bf16.mxu0 %v3140_v57  ;;  %1391 = vmatprep.subr.bf16.mxu1 %v3143_v58  ;;  %v3212_v49 = vld [vmem:[#allocation5 + $0x3a4] ss:$16 sps:$4 sm:$0xff]   ;;  %v3215_v50 = vld [vmem:[#allocation5 + $0x3ac] ss:$16 sps:$4 sm:$0xff]   ;;  %v3210_v51 = vld [vmem:[#allocation5 + $0x3a0] ss:$16 sps:$4 sm:$0xff]  }
 0x137   :  { %1335 = vmatprep.mubr.bf16.mxu0 %v598_v0  ;;  %1421 = vmatprep.mubr.bf16.mxu1 %v598_v0  ;;  %v3213_v52 = vld [vmem:[#allocation5 + $0x3a8] ss:$16 sps:$4 sm:$0xff]   ;;  %v3218_v53 = vld [vmem:[#allocation5 + $0x3c4] ss:$16 sps:$4 sm:$0xff]   ;;  %v3221_v54 = vld [vmem:[#allocation5 + $0x3cc] ss:$16 sps:$4 sm:$0xff]  }
 0x138   :  { %v3216_v55 = vld [vmem:[#allocation5 + $0x3c0] ss:$16 sps:$4 sm:$0xff]   ;;  %v3219_v56 = vld [vmem:[#allocation5 + $0x3c8] ss:$16 sps:$4 sm:$0xff]   ;;  %v3224_v57 = vld [vmem:[#allocation5 + $0x3e4] ss:$16 sps:$4 sm:$0xff]  }
 0x139   :  { %1306 = vmatpush1.bf16.msra.mxu0 %v3138_v62  ;;  %1392 = vmatpush1.bf16.msra.mxu1 %v3141_v63  ;;  %v3227_v58 = vld [vmem:[#allocation5 + $0x3ec] ss:$16 sps:$4 sm:$0xff]   ;;  %v3222_v59 = vld [vmem:[#allocation5 + $0x3e0] ss:$16 sps:$4 sm:$0xff]   ;;  %v3225_v60 = vld [vmem:[#allocation5 + $0x3e8] ss:$16 sps:$4 sm:$0xff]  }
 0x13a   :  { %1307 = vmatprep.subr.bf16.mxu0 %v3146_v1  ;;  %1393 = vmatprep.subr.bf16.mxu1 %v3149_v2  ;;  %v3230_v62 = vld [vmem:[#allocation7 + $0x4] ss:$16 sps:$4 sm:$0xff]   ;;  %v3233_v63 = vld [vmem:[#allocation7 + $0xc] ss:$16 sps:$4 sm:$0xff]   ;;  %v3228_v0 = vld [vmem:[#allocation7] ss:$16 sps:$4 sm:$0xff]  }
 0x13b   :  { %v3231_v1 = vld [vmem:[#allocation7 + $0x8] ss:$16 sps:$4 sm:$0xff]   ;;  %v3236_v2 = vld [vmem:[#allocation7 + $0x24] ss:$16 sps:$4 sm:$0xff]  }
 0x13d   :  { %1308 = vmatpush1.bf16.msra.mxu0 %v3144_v3  ;;  %1394 = vmatpush1.bf16.msra.mxu1 %v3147_v4  ;;  %v3239_v3 = vld [vmem:[#allocation7 + $0x2c] ss:$16 sps:$4 sm:$0xff]   ;;  %v3234_v4 = vld [vmem:[#allocation7 + $0x20] ss:$16 sps:$4 sm:$0xff]  }
 0x13e   :  { %1309 = vmatprep.subr.bf16.mxu0 %v3152_v5  ;;  %1395 = vmatprep.subr.bf16.mxu1 %v3155_v6  ;;  %v3237_v5 = vld [vmem:[#allocation7 + $0x28] ss:$16 sps:$4 sm:$0xff]   ;;  %v3242_v6 = vld [vmem:[#allocation7 + $0x44] ss:$16 sps:$4 sm:$0xff]  }
 0x141   :  { %1310 = vmatpush1.bf16.msra.mxu0 %v3150_v7  ;;  %1396 = vmatpush1.bf16.msra.mxu1 %v3153_v8  ;;  %v3245_v7 = vld [vmem:[#allocation7 + $0x4c] ss:$16 sps:$4 sm:$0xff]   ;;  %v3240_v8 = vld [vmem:[#allocation7 + $0x40] ss:$16 sps:$4 sm:$0xff]  }
 0x142   :  { %1311 = vmatprep.subr.bf16.mxu0 %v3158_v9  ;;  %1397 = vmatprep.subr.bf16.mxu1 %v3161_v10  ;;  %v3243_v9 = vld [vmem:[#allocation7 + $0x48] ss:$16 sps:$4 sm:$0xff]   ;;  %v3248_v10 = vld [vmem:[#allocation7 + $0x64] ss:$16 sps:$4 sm:$0xff]  }
 0x145   :  { %1312 = vmatpush1.bf16.msra.mxu0 %v3156_v11  ;;  %1398 = vmatpush1.bf16.msra.mxu1 %v3159_v12  ;;  %v3251_v11 = vld [vmem:[#allocation7 + $0x6c] ss:$16 sps:$4 sm:$0xff]   ;;  %v3246_v12 = vld [vmem:[#allocation7 + $0x60] ss:$16 sps:$4 sm:$0xff]  }
 0x146   :  { %1313 = vmatprep.subr.bf16.mxu0 %v3164_v13  ;;  %1399 = vmatprep.subr.bf16.mxu1 %v3167_v15  ;;  %v3254_v13 = vld [vmem:[#allocation7 + $0x84] ss:$16 sps:$4 sm:$0xff]   ;;  %v3257_v15 = vld [vmem:[#allocation7 + $0x8c] ss:$16 sps:$4 sm:$0xff]  }
 0x149   :  { %1314 = vmatpush1.bf16.msra.mxu0 %v3162_v17  ;;  %1400 = vmatpush1.bf16.msra.mxu1 %v3165_v19  ;;  %v3252_v17 = vld [vmem:[#allocation7 + $0x80] ss:$16 sps:$4 sm:$0xff]   ;;  %v3255_v19 = vld [vmem:[#allocation7 + $0x88] ss:$16 sps:$4 sm:$0xff]  }
 0x14a   :  { %1315 = vmatprep.subr.bf16.mxu0 %v3170_v21  ;;  %1401 = vmatprep.subr.bf16.mxu1 %v3173_v22  ;;  %v3260_v21 = vld [vmem:[#allocation7 + $0xa4] ss:$16 sps:$4 sm:$0xff]   ;;  %v3263_v22 = vld [vmem:[#allocation7 + $0xac] ss:$16 sps:$4 sm:$0xff]  }
 0x14d   :  { %1316 = vmatpush1.bf16.msra.mxu0 %v3168_v23  ;;  %1402 = vmatpush1.bf16.msra.mxu1 %v3171_v24  ;;  %v3258_v23 = vld [vmem:[#allocation7 + $0xa0] ss:$16 sps:$4 sm:$0xff]   ;;  %v3261_v24 = vld [vmem:[#allocation7 + $0xa8] ss:$16 sps:$4 sm:$0xff]  }
 0x14e   :  { %1317 = vmatprep.subr.bf16.mxu0 %v3176_v25  ;;  %1403 = vmatprep.subr.bf16.mxu1 %v3179_v26  ;;  %v3266_v25 = vld [vmem:[#allocation7 + $0xc4] ss:$16 sps:$4 sm:$0xff]   ;;  %v3269_v26 = vld [vmem:[#allocation7 + $0xcc] ss:$16 sps:$4 sm:$0xff]  }
 0x151   :  { %1318 = vmatpush1.bf16.msra.mxu0 %v3174_v27  ;;  %1404 = vmatpush1.bf16.msra.mxu1 %v3177_v28  ;;  %v3264_v27 = vld [vmem:[#allocation7 + $0xc0] ss:$16 sps:$4 sm:$0xff]   ;;  %v3267_v28 = vld [vmem:[#allocation7 + $0xc8] ss:$16 sps:$4 sm:$0xff]  }
 0x152   :  { %1319 = vmatprep.subr.bf16.mxu0 %v3182_v29  ;;  %1405 = vmatprep.subr.bf16.mxu1 %v3185_v30  ;;  %v3272_v29 = vld [vmem:[#allocation7 + $0xe4] ss:$16 sps:$4 sm:$0xff]   ;;  %v3275_v30 = vld [vmem:[#allocation7 + $0xec] ss:$16 sps:$4 sm:$0xff]  }
 0x155   :  { %1320 = vmatpush1.bf16.msra.mxu0 %v3180_v31  ;;  %1406 = vmatpush1.bf16.msra.mxu1 %v3183_v32  ;;  %v3270_v31 = vld [vmem:[#allocation7 + $0xe0] ss:$16 sps:$4 sm:$0xff]   ;;  %v3273_v32 = vld [vmem:[#allocation7 + $0xe8] ss:$16 sps:$4 sm:$0xff]  }
 0x156   :  { %1321 = vmatprep.subr.bf16.mxu0 %v3188_v33  ;;  %1407 = vmatprep.subr.bf16.mxu1 %v3191_v34  ;;  %v3278_v33 = vld [vmem:[#allocation7 + $0x104] ss:$16 sps:$4 sm:$0xff]   ;;  %v3281_v34 = vld [vmem:[#allocation7 + $0x10c] ss:$16 sps:$4 sm:$0xff]  }
 0x159   :  { %1322 = vmatpush1.bf16.msra.mxu0 %v3186_v35  ;;  %1408 = vmatpush1.bf16.msra.mxu1 %v3189_v36  ;;  %v3276_v35 = vld [vmem:[#allocation7 + $0x100] ss:$16 sps:$4 sm:$0xff]   ;;  %v3279_v36 = vld [vmem:[#allocation7 + $0x108] ss:$16 sps:$4 sm:$0xff]  }
 0x15a   :  { %1323 = vmatprep.subr.bf16.mxu0 %v3194_v37  ;;  %1409 = vmatprep.subr.bf16.mxu1 %v3197_v38  ;;  %v3284_v37 = vld [vmem:[#allocation7 + $0x124] ss:$16 sps:$4 sm:$0xff]   ;;  %v3287_v38 = vld [vmem:[#allocation7 + $0x12c] ss:$16 sps:$4 sm:$0xff]  }
 0x15d   :  { %1324 = vmatpush1.bf16.msra.mxu0 %v3192_v39  ;;  %1410 = vmatpush1.bf16.msra.mxu1 %v3195_v40  ;;  %v3282_v39 = vld [vmem:[#allocation7 + $0x120] ss:$16 sps:$4 sm:$0xff]   ;;  %v3285_v40 = vld [vmem:[#allocation7 + $0x128] ss:$16 sps:$4 sm:$0xff]  }
 0x15e   :  { %1325 = vmatprep.subr.bf16.mxu0 %v3200_v41  ;;  %1411 = vmatprep.subr.bf16.mxu1 %v3203_v42  ;;  %v3290_v41 = vld [vmem:[#allocation7 + $0x144] ss:$16 sps:$4 sm:$0xff]   ;;  %v3293_v42 = vld [vmem:[#allocation7 + $0x14c] ss:$16 sps:$4 sm:$0xff]  }
 0x161   :  { %1326 = vmatpush1.bf16.msra.mxu0 %v3198_v43  ;;  %1412 = vmatpush1.bf16.msra.mxu1 %v3201_v44  ;;  %v3288_v43 = vld [vmem:[#allocation7 + $0x140] ss:$16 sps:$4 sm:$0xff]   ;;  %v3291_v44 = vld [vmem:[#allocation7 + $0x148] ss:$16 sps:$4 sm:$0xff]  }
 0x162   :  { %1327 = vmatprep.subr.bf16.mxu0 %v3206_v45  ;;  %1413 = vmatprep.subr.bf16.mxu1 %v3209_v46  ;;  %v3296_v45 = vld [vmem:[#allocation7 + $0x164] ss:$16 sps:$4 sm:$0xff]   ;;  %v3299_v46 = vld [vmem:[#allocation7 + $0x16c] ss:$16 sps:$4 sm:$0xff]  }
 0x165   :  { %1328 = vmatpush1.bf16.msra.mxu0 %v3204_v47  ;;  %1414 = vmatpush1.bf16.msra.mxu1 %v3207_v48  ;;  %v3294_v47 = vld [vmem:[#allocation7 + $0x160] ss:$16 sps:$4 sm:$0xff]   ;;  %v3297_v48 = vld [vmem:[#allocation7 + $0x168] ss:$16 sps:$4 sm:$0xff]  }
 0x166   :  { %1329 = vmatprep.subr.bf16.mxu0 %v3212_v49  ;;  %1415 = vmatprep.subr.bf16.mxu1 %v3215_v50  ;;  %v3302_v49 = vld [vmem:[#allocation7 + $0x184] ss:$16 sps:$4 sm:$0xff]   ;;  %v3305_v50 = vld [vmem:[#allocation7 + $0x18c] ss:$16 sps:$4 sm:$0xff]  }
 0x169   :  { %1330 = vmatpush1.bf16.msra.mxu0 %v3210_v51  ;;  %1416 = vmatpush1.bf16.msra.mxu1 %v3213_v52  ;;  %v3300_v51 = vld [vmem:[#allocation7 + $0x180] ss:$16 sps:$4 sm:$0xff]   ;;  %v3303_v52 = vld [vmem:[#allocation7 + $0x188] ss:$16 sps:$4 sm:$0xff]  }
 0x16a   :  { %1331 = vmatprep.subr.bf16.mxu0 %v3218_v53  ;;  %1417 = vmatprep.subr.bf16.mxu1 %v3221_v54  ;;  %v3308_v53 = vld [vmem:[#allocation7 + $0x1a4] ss:$16 sps:$4 sm:$0xff]   ;;  %v3311_v54 = vld [vmem:[#allocation7 + $0x1ac] ss:$16 sps:$4 sm:$0xff]  }
 0x16d   :  { %1332 = vmatpush1.bf16.msra.mxu0 %v3216_v55  ;;  %1418 = vmatpush1.bf16.msra.mxu1 %v3219_v56  ;;  %v3306_v55 = vld [vmem:[#allocation7 + $0x1a0] ss:$16 sps:$4 sm:$0xff]   ;;  %v3309_v56 = vld [vmem:[#allocation7 + $0x1a8] ss:$16 sps:$4 sm:$0xff]  }
 0x16e   :  { %1333 = vmatprep.subr.bf16.mxu0 %v3224_v57  ;;  %1419 = vmatprep.subr.bf16.mxu1 %v3227_v58  ;;  %v3314_v57 = vld [vmem:[#allocation7 + $0x1c4] ss:$16 sps:$4 sm:$0xff]   ;;  %v3317_v58 = vld [vmem:[#allocation7 + $0x1cc] ss:$16 sps:$4 sm:$0xff]  }
 0x171   :  { %1334 = vmatpush1.bf16.msra.mxu0 %v3222_v59  ;;  %1420 = vmatpush1.bf16.msra.mxu1 %v3225_v60  ;;  %v3312_v59 = vld [vmem:[#allocation7 + $0x1c0] ss:$16 sps:$4 sm:$0xff]   ;;  %v3315_v60 = vld [vmem:[#allocation7 + $0x1c8] ss:$16 sps:$4 sm:$0xff]  }
 0x172   :  { %2113 = vmatprep.subr.bf16.mxu0 %v3230_v62  ;;  %2199 = vmatprep.subr.bf16.mxu1 %v3233_v63  ;;  %v3320_v62 = vld [vmem:[#allocation7 + $0x1e4] ss:$16 sps:$4 sm:$0xff]   ;;  %v3323_v63 = vld [vmem:[#allocation7 + $0x1ec] ss:$16 sps:$4 sm:$0xff]  }
 0x174   :  { %1336 = vmatmul.mubr.bf16.vlgmr.msra.gmra.mrb[4].mxu0 %v3732_v61  ;;  %1422 = vmatmul.mubr.bf16.vlgmr.msra.gmra.mrb[4].mxu1 %v3732_v61  ;;  %v3249_v61 = vld [vmem:[#allocation7 + $0x68] ss:$16 sps:$4 sm:$0xff]  }
 0x175   :  { %2114 = vmatpush1.bf16.msra.mxu0 %v3228_v0  ;;  %2200 = vmatpush1.bf16.msra.mxu1 %v3231_v1  ;;  %v3318_v0 = vld [vmem:[#allocation7 + $0x1e0] ss:$16 sps:$4 sm:$0xff]   ;;  %v3321_v1 = vld [vmem:[#allocation7 + $0x1e8] ss:$16 sps:$4 sm:$0xff]  }
 0x176   :  { %2115 = vmatprep.subr.bf16.mxu0 %v3236_v2  ;;  %2201 = vmatprep.subr.bf16.mxu1 %v3239_v3  ;;  %v3326_v2 = vld [vmem:[#allocation7 + $0x204] ss:$16 sps:$4 sm:$0xff]   ;;  %v3329_v3 = vld [vmem:[#allocation7 + $0x20c] ss:$16 sps:$4 sm:$0xff]  }
 0x179   :  { %2116 = vmatpush1.bf16.msra.mxu0 %v3234_v4  ;;  %2202 = vmatpush1.bf16.msra.mxu1 %v3237_v5  ;;  %v226_v4 = vld [vmem:[%s3776_s4] sm:$0xf] }
 0x17a   :  { %2117 = vmatprep.subr.bf16.mxu0 %v3242_v6  ;;  %2203 = vmatprep.subr.bf16.mxu1 %v3245_v7  ;;  %v603_v5 = vrot.slane %v226_v4, %v3717_v14  ;;  %v611_v6 = vrot.slane %v226_v4, %v3725_v18  ;;  %v607_v7 = vrot.slane %v226_v4, %v3722_v16 }
 0x17d   :  { %2118 = vmatpush1.bf16.msra.mxu0 %v3240_v8  ;;  %2204 = vmatpush1.bf16.msra.mxu1 %v3243_v9  ;;  %v615_v8 = vrot.slane %v226_v4, %v3728_v20  ;;  %v3359_v4 = vld [vmem:[#allocation7 + $0x2ac] ss:$16 sps:$4 sm:$0xff]  }
 0x17e   :  { %2119 = vmatprep.subr.bf16.mxu0 %v3248_v10  ;;  %2205 = vmatprep.subr.bf16.mxu1 %v3251_v11 }
 0x181   :  { %2120 = vmatpush1.bf16.msra.mxu0 %v3246_v12  ;;  %2206 = vmatpush1.bf16.msra.mxu1 %v3249_v61 }
 0x182   :  { %2121 = vmatprep.subr.bf16.mxu0 %v3254_v13  ;;  %2207 = vmatprep.subr.bf16.mxu1 %v3257_v15 }
 0x185   :  { %2122 = vmatpush1.bf16.msra.mxu0 %v3252_v17  ;;  %2208 = vmatpush1.bf16.msra.mxu1 %v3255_v19 }
 0x186   :  { %2123 = vmatprep.subr.bf16.mxu0 %v3260_v21  ;;  %2209 = vmatprep.subr.bf16.mxu1 %v3263_v22 }
 0x189   :  { %2124 = vmatpush1.bf16.msra.mxu0 %v3258_v23  ;;  %2210 = vmatpush1.bf16.msra.mxu1 %v3261_v24 }
 0x18a   :  { %2125 = vmatprep.subr.bf16.mxu0 %v3266_v25  ;;  %2211 = vmatprep.subr.bf16.mxu1 %v3269_v26 }
 0x18d   :  { %2126 = vmatpush1.bf16.msra.mxu0 %v3264_v27  ;;  %2212 = vmatpush1.bf16.msra.mxu1 %v3267_v28 }
 0x18e   :  { %2127 = vmatprep.subr.bf16.mxu0 %v3272_v29  ;;  %2213 = vmatprep.subr.bf16.mxu1 %v3275_v30 }
 0x191   :  { %2128 = vmatpush1.bf16.msra.mxu0 %v3270_v31  ;;  %2214 = vmatpush1.bf16.msra.mxu1 %v3273_v32 }
 0x192   :  { %2129 = vmatprep.subr.bf16.mxu0 %v3278_v33  ;;  %2215 = vmatprep.subr.bf16.mxu1 %v3281_v34 }
 0x195   :  { %2130 = vmatpush1.bf16.msra.mxu0 %v3276_v35  ;;  %2216 = vmatpush1.bf16.msra.mxu1 %v3279_v36 }
 0x196   :  { %2131 = vmatprep.subr.bf16.mxu0 %v3284_v37  ;;  %2217 = vmatprep.subr.bf16.mxu1 %v3287_v38 }
 0x199   :  { %2132 = vmatpush1.bf16.msra.mxu0 %v3282_v39  ;;  %2218 = vmatpush1.bf16.msra.mxu1 %v3285_v40 }
 0x19a   :  { %2133 = vmatprep.subr.bf16.mxu0 %v3290_v41  ;;  %2219 = vmatprep.subr.bf16.mxu1 %v3293_v42 }
 0x19d   :  { %2134 = vmatpush1.bf16.msra.mxu0 %v3288_v43  ;;  %2220 = vmatpush1.bf16.msra.mxu1 %v3291_v44 }
 0x19e   :  { %2135 = vmatprep.subr.bf16.mxu0 %v3296_v45  ;;  %2221 = vmatprep.subr.bf16.mxu1 %v3299_v46 }
 0x1a1   :  { %2136 = vmatpush1.bf16.msra.mxu0 %v3294_v47  ;;  %2222 = vmatpush1.bf16.msra.mxu1 %v3297_v48  ;;  %v3324_v47 = vld [vmem:[#allocation7 + $0x200] ss:$16 sps:$4 sm:$0xff]   ;;  %v3327_v48 = vld [vmem:[#allocation7 + $0x208] ss:$16 sps:$4 sm:$0xff]  }
 0x1a2   :  { %2137 = vmatprep.subr.bf16.mxu0 %v3302_v49  ;;  %2223 = vmatprep.subr.bf16.mxu1 %v3305_v50  ;;  %v3332_v50 = vld [vmem:[#allocation7 + $0x224] ss:$16 sps:$4 sm:$0xff]  }
 0x1a5   :  { %2138 = vmatpush1.bf16.msra.mxu0 %v3300_v51  ;;  %2224 = vmatpush1.bf16.msra.mxu1 %v3303_v52  ;;  %v3335_v51 = vld [vmem:[#allocation7 + $0x22c] ss:$16 sps:$4 sm:$0xff]   ;;  %v3330_v52 = vld [vmem:[#allocation7 + $0x220] ss:$16 sps:$4 sm:$0xff]  }
 0x1a6   :  { %2139 = vmatprep.subr.bf16.mxu0 %v3308_v53  ;;  %2225 = vmatprep.subr.bf16.mxu1 %v3311_v54  ;;  %v3333_v53 = vld [vmem:[#allocation7 + $0x228] ss:$16 sps:$4 sm:$0xff]   ;;  %v3338_v54 = vld [vmem:[#allocation7 + $0x244] ss:$16 sps:$4 sm:$0xff]  }
 0x1a9   :  { %2140 = vmatpush1.bf16.msra.mxu0 %v3306_v55  ;;  %2226 = vmatpush1.bf16.msra.mxu1 %v3309_v56  ;;  %v3341_v55 = vld [vmem:[#allocation7 + $0x24c] ss:$16 sps:$4 sm:$0xff]   ;;  %v3336_v56 = vld [vmem:[#allocation7 + $0x240] ss:$16 sps:$4 sm:$0xff]  }
 0x1aa   :  { %2141 = vmatprep.subr.bf16.mxu0 %v3314_v57  ;;  %2227 = vmatprep.subr.bf16.mxu1 %v3317_v58  ;;  %v3339_v57 = vld [vmem:[#allocation7 + $0x248] ss:$16 sps:$4 sm:$0xff]   ;;  %v3344_v58 = vld [vmem:[#allocation7 + $0x264] ss:$16 sps:$4 sm:$0xff]  }
 0x1ad   :  { %2142 = vmatpush1.bf16.msra.mxu0 %v3312_v59  ;;  %2228 = vmatpush1.bf16.msra.mxu1 %v3315_v60  ;;  %v3347_v59 = vld [vmem:[#allocation7 + $0x26c] ss:$16 sps:$4 sm:$0xff]   ;;  %v3342_v60 = vld [vmem:[#allocation7 + $0x260] ss:$16 sps:$4 sm:$0xff]  }
 0x1ae   :  { %2143 = vmatprep.subr.bf16.mxu0 %v3320_v62  ;;  %2229 = vmatprep.subr.bf16.mxu1 %v3323_v63  ;;  %v3345_v62 = vld [vmem:[#allocation7 + $0x268] ss:$16 sps:$4 sm:$0xff]   ;;  %v3350_v63 = vld [vmem:[#allocation7 + $0x284] ss:$16 sps:$4 sm:$0xff]  }
 0x1b1   :  { %2144 = vmatpush1.bf16.msra.mxu0 %v3318_v0  ;;  %2230 = vmatpush1.bf16.msra.mxu1 %v3321_v1  ;;  %v3353_v0 = vld [vmem:[#allocation7 + $0x28c] ss:$16 sps:$4 sm:$0xff]   ;;  %v3348_v1 = vld [vmem:[#allocation7 + $0x280] ss:$16 sps:$4 sm:$0xff]  }
 0x1b2   :  { %2156 = vmatprep.subr.bf16.mxu0 %v3326_v2  ;;  %2242 = vmatprep.subr.bf16.mxu1 %v3329_v3  ;;  %v3351_v2 = vld [vmem:[#allocation7 + $0x288] ss:$16 sps:$4 sm:$0xff]   ;;  %v3356_v3 = vld [vmem:[#allocation7 + $0x2a4] ss:$16 sps:$4 sm:$0xff]  }
 0x247   :  { %v1337_v9 = vpop.f32.mrb[4].mxu0  ;;  %v1423_v10 = vpop.f32.mrb[4].mxu1 }
 0x248   :  { %v2981_v11 = vadd.f32 %v1337_v9, %v603_v5  ;;  %v2985_v12 = vadd.f32 %v1423_v10, %v611_v6  ;;  %v1339_v61 = vpop.f32.mrb[5].mxu0  ;;  %v1425_v13 = vpop.f32.mrb[5].mxu1  ;;  %v3360_v9 = vld [vmem:[#allocation7 + $0x2c0] ss:$16 sps:$4 sm:$0xff]   ;;  %v3363_v10 = vld [vmem:[#allocation7 + $0x2c8] ss:$16 sps:$4 sm:$0xff]  }
 0x249   :  { %v2982_v15 = vadd.f32 %v1339_v61, %v607_v7  ;;  %v2986_v17 = vadd.f32 %v1425_v13, %v615_v8  ;;  %v1341_v19 = vpop.f32.mrb[6].mxu0  ;;  %v1427_v21 = vpop.f32.mrb[6].mxu1  ;;  %v3366_v61 = vld [vmem:[#allocation7 + $0x2e0] ss:$16 sps:$4 sm:$0xff]   ;;  %v3369_v13 = vld [vmem:[#allocation7 + $0x2e8] ss:$16 sps:$4 sm:$0xff]  }
 0x24a   :  { %v1432_v22 = vmul.f32 0.01, %v2981_v11  ;;  %v1434_v23 = vmul.f32 0.01, %v2985_v12  ;;  %v2983_v24 = vadd.f32 %v1341_v19, %v603_v5  ;;  %v2987_v25 = vadd.f32 %v1427_v21, %v611_v6  ;;  %v1343_v26 = vpop.f32.mrb[7].mxu0  ;;  %v1429_v27 = vpop.f32.mrb[7].mxu1 }
 0x24b   :  { %v1433_v28 = vmul.f32 0.01, %v2982_v15  ;;  %v1435_v29 = vmul.f32 0.01, %v2986_v17  ;;  %v2984_v30 = vadd.f32 %v1343_v26, %v607_v7  ;;  %v2988_v31 = vadd.f32 %v1429_v27, %v615_v8  ;;  %v3354_v5 = vld [vmem:[#allocation7 + $0x2a0] ss:$16 sps:$4 sm:$0xff]  }
 0x24c   :  { %v1436_v32 = vmul.f32 0.01, %v2983_v24  ;;  %v1438_v33 = vmul.f32 0.01, %v2987_v25  ;;  %v1440_v36 = vmax.f32 %v2981_v11, %v1432_v22  ;;  %v1442_v37 = vmax.f32 %v2985_v12, %v1434_v23  ;;  %v3357_v6 = vld [vmem:[#allocation7 + $0x2a8] ss:$16 sps:$4 sm:$0xff]  }
 0x24d   :  { %v1437_v34 = vmul.f32 0.01, %v2984_v30  ;;  %v1439_v35 = vmul.f32 0.01, %v2988_v31  ;;  %v1441_v40 = vmax.f32 %v2982_v15, %v1433_v28  ;;  %v1443_v41 = vmax.f32 %v2986_v17, %v1435_v29  ;;  %v3362_v7 = vld [vmem:[#allocation7 + $0x2c4] ss:$16 sps:$4 sm:$0xff]  }
 0x24e   :  { %v1444_v38 = vmax.f32 %v2983_v24, %v1436_v32  ;;  %v1446_v39 = vmax.f32 %v2987_v25, %v1438_v33  ;;  %v3365_v8 = vld [vmem:[#allocation7 + $0x2cc] ss:$16 sps:$4 sm:$0xff]   ;;  %v3368_v11 = vld [vmem:[#allocation7 + $0x2e4] ss:$16 sps:$4 sm:$0xff]   ;;  %v3372_v19 = vld [vmem:[#allocation7 + $0x300] ss:$16 sps:$4 sm:$0xff]  }
 0x24f   :  { %v1445_v42 = vmax.f32 %v2984_v30, %v1437_v34  ;;  %v1447_v43 = vmax.f32 %v2988_v31, %v1439_v35  ;;  %v3371_v12 = vld [vmem:[#allocation7 + $0x2ec] ss:$16 sps:$4 sm:$0xff]   ;;  %v3374_v15 = vld [vmem:[#allocation7 + $0x304] ss:$16 sps:$4 sm:$0xff]   ;;  %v3375_v21 = vld [vmem:[#allocation7 + $0x308] ss:$16 sps:$4 sm:$0xff]  }
 0x250   :  { %v1448_v44 = vpack.c.bf16 %v1444_v38, %v1440_v36  ;;  %v3743_v45 = vpack.c.bf16 %v1446_v39, %v1442_v37  ;;  %v3377_v17 = vld [vmem:[#allocation7 + $0x30c] ss:$16 sps:$4 sm:$0xff]   ;;  %v3380_v22 = vld [vmem:[#allocation7 + $0x324] ss:$16 sps:$4 sm:$0xff]   ;;  %v3378_v24 = vld [vmem:[#allocation7 + $0x320] ss:$16 sps:$4 sm:$0xff]  }
 0x251   :  { %v1449_v46 = vpack.c.bf16 %v1445_v42, %v1441_v40  ;;  %v1451_v49 = vpack.c.bf16 %v1447_v43, %v1443_v41  ;;  %v3383_v23 = vld [vmem:[#allocation7 + $0x32c] ss:$16 sps:$4 sm:$0xff]   ;;  %v3381_v25 = vld [vmem:[#allocation7 + $0x328] ss:$16 sps:$4 sm:$0xff]   ;;  %v3386_v26 = vld [vmem:[#allocation7 + $0x344] ss:$16 sps:$4 sm:$0xff]  }
 0x252   :  { %v3389_v27 = vld [vmem:[#allocation7 + $0x34c] ss:$16 sps:$4 sm:$0xff]   ;;  %v3384_v28 = vld [vmem:[#allocation7 + $0x340] ss:$16 sps:$4 sm:$0xff]   ;;  %v3387_v29 = vld [vmem:[#allocation7 + $0x348] ss:$16 sps:$4 sm:$0xff]  }
 0x253   :  { %2145 = vmatprep.mubr.bf16.mxu0 %v1449_v46  ;;  %2231 = vmatprep.mubr.bf16.mxu1 %v1449_v46  ;;  %v3392_v30 = vld [vmem:[#allocation7 + $0x364] ss:$16 sps:$4 sm:$0xff]   ;;  %v3395_v31 = vld [vmem:[#allocation7 + $0x36c] ss:$16 sps:$4 sm:$0xff]   ;;  %v3390_v32 = vld [vmem:[#allocation7 + $0x360] ss:$16 sps:$4 sm:$0xff]  }
 0x254   :  { %2146 = vmatmul.mubr.bf16.vlgmr.msra.gmra.mrb[8].mxu0 %v1448_v44  ;;  %2232 = vmatmul.mubr.bf16.vlgmr.msra.gmra.mrb[8].mxu1 %v1448_v44  ;;  %v3393_v33 = vld [vmem:[#allocation7 + $0x368] ss:$16 sps:$4 sm:$0xff]   ;;  %v3398_v34 = vld [vmem:[#allocation7 + $0x384] ss:$16 sps:$4 sm:$0xff]   ;;  %v3401_v35 = vld [vmem:[#allocation7 + $0x38c] ss:$16 sps:$4 sm:$0xff]  }
 0x255   :  { %2157 = vmatpush1.bf16.msra.mxu0 %v3324_v47  ;;  %2243 = vmatpush1.bf16.msra.mxu1 %v3327_v48  ;;  %v3396_v36 = vld [vmem:[#allocation7 + $0x380] ss:$16 sps:$4 sm:$0xff]   ;;  %v3399_v37 = vld [vmem:[#allocation7 + $0x388] ss:$16 sps:$4 sm:$0xff]   ;;  %v3404_v38 = vld [vmem:[#allocation7 + $0x3a4] ss:$16 sps:$4 sm:$0xff]  }
 0x256   :  { %2188 = vmatprep.mubr.bf16.mxu0 %v1451_v49  ;;  %2274 = vmatprep.mubr.bf16.mxu1 %v1451_v49  ;;  %v3407_v39 = vld [vmem:[#allocation7 + $0x3ac] ss:$16 sps:$4 sm:$0xff]   ;;  %v3402_v40 = vld [vmem:[#allocation7 + $0x3a0] ss:$16 sps:$4 sm:$0xff]   ;;  %v3405_v41 = vld [vmem:[#allocation7 + $0x3a8] ss:$16 sps:$4 sm:$0xff]  }
 0x257   :  { %2158 = vmatprep.subr.bf16.mxu0 %v3332_v50  ;;  %2244 = vmatprep.subr.bf16.mxu1 %v3335_v51  ;;  %v3410_v42 = vld [vmem:[#allocation7 + $0x3c4] ss:$16 sps:$4 sm:$0xff]   ;;  %v3413_v43 = vld [vmem:[#allocation7 + $0x3cc] ss:$16 sps:$4 sm:$0xff]   ;;  %v3408_v44 = vld [vmem:[#allocation7 + $0x3c0] ss:$16 sps:$4 sm:$0xff]  }
 0x258   :  { %v3411_v46 = vld [vmem:[#allocation7 + $0x3c8] ss:$16 sps:$4 sm:$0xff]   ;;  %v3416_v47 = vld [vmem:[#allocation7 + $0x3e4] ss:$16 sps:$4 sm:$0xff]   ;;  %v3419_v48 = vld [vmem:[#allocation7 + $0x3ec] ss:$16 sps:$4 sm:$0xff]  }
 0x259   :  { %2159 = vmatpush1.bf16.msra.mxu0 %v3330_v52  ;;  %2245 = vmatpush1.bf16.msra.mxu1 %v3333_v53  ;;  %v3414_v49 = vld [vmem:[#allocation7 + $0x3e0] ss:$16 sps:$4 sm:$0xff]   ;;  %v3417_v50 = vld [vmem:[#allocation7 + $0x3e8] ss:$16 sps:$4 sm:$0xff]  }
 0x25a   :  { %2160 = vmatprep.subr.bf16.mxu0 %v3338_v54  ;;  %2246 = vmatprep.subr.bf16.mxu1 %v3341_v55  ;;  %v3420_v51 = vld [vmem:[#allocation8 + $0x40] sm:$0xff]   ;;  %v3424_v55 = vld [vmem:[#allocation8 + $0x48] sm:$0xff]  }
 0x25b   :  { %v3421_v52 = vld [vmem:[#allocation8 + $0xc0] sm:$0xff]  }
 0x25c   :  { %v3422_v53 = vld [vmem:[#allocation8] sm:$0xff]  }
 0x25d   :  { %2161 = vmatpush1.bf16.msra.mxu0 %v3336_v56  ;;  %2247 = vmatpush1.bf16.msra.mxu1 %v3339_v57  ;;  %v3423_v54 = vld [vmem:[#allocation8 + $0x80] sm:$0xff]   ;;  %v3425_v56 = vld [vmem:[#allocation8 + $0xc8] sm:$0xff]  }
 0x25e   :  { %2162 = vmatprep.subr.bf16.mxu0 %v3344_v58  ;;  %2248 = vmatprep.subr.bf16.mxu1 %v3347_v59  ;;  %v3426_v57 = vld [vmem:[#allocation8 + $0x8] sm:$0xff]   ;;  %v3428_v59 = vld [vmem:[#allocation8 + $0x50] sm:$0xff]  }
 0x25f   :  { %v3427_v58 = vld [vmem:[#allocation8 + $0x88] sm:$0xff]  }
 0x261   :  { %2163 = vmatpush1.bf16.msra.mxu0 %v3342_v60  ;;  %2249 = vmatpush1.bf16.msra.mxu1 %v3345_v62  ;;  %v3429_v60 = vld [vmem:[#allocation8 + $0xd0] sm:$0xff]  }
 0x262   :  { %2164 = vmatprep.subr.bf16.mxu0 %v3350_v63  ;;  %2250 = vmatprep.subr.bf16.mxu1 %v3353_v0  ;;  %v3430_v62 = vld [vmem:[#allocation8 + $0x10] sm:$0xff]   ;;  %v3432_v0 = vld [vmem:[#allocation8 + $0x58] sm:$0xff]  }
 0x263   :  { %v3431_v63 = vld [vmem:[#allocation8 + $0x90] sm:$0xff]  }
 0x265   :  { %2165 = vmatpush1.bf16.msra.mxu0 %v3348_v1  ;;  %2251 = vmatpush1.bf16.msra.mxu1 %v3351_v2  ;;  %v3433_v1 = vld [vmem:[#allocation8 + $0xd8] sm:$0xff]  }
 0x266   :  { %2166 = vmatprep.subr.bf16.mxu0 %v3356_v3  ;;  %2252 = vmatprep.subr.bf16.mxu1 %v3359_v4  ;;  %v3434_v2 = vld [vmem:[#allocation8 + $0x18] sm:$0xff]   ;;  %v3436_v3 = vld [vmem:[#allocation8 + $0x60] sm:$0xff]  }
 0x267   :  { %v3437_v4 = vld [vmem:[#allocation8 + $0xe0] sm:$0xff]  }
 0x269   :  { %2167 = vmatpush1.bf16.msra.mxu0 %v3354_v5  ;;  %2253 = vmatpush1.bf16.msra.mxu1 %v3357_v6  ;;  %v3438_v5 = vld [vmem:[#allocation8 + $0x20] sm:$0xff]  }
 0x26a   :  { %2168 = vmatprep.subr.bf16.mxu0 %v3362_v7  ;;  %2254 = vmatprep.subr.bf16.mxu1 %v3365_v8  ;;  %v3439_v6 = vld [vmem:[#allocation8 + $0xa0] sm:$0xff]   ;;  %v3440_v7 = vld [vmem:[#allocation8 + $0x68] sm:$0xff]  }
 0x26b   :  { %v3441_v8 = vld [vmem:[#allocation8 + $0xe8] sm:$0xff]  }
 0x26d   :  { %2169 = vmatpush1.bf16.msra.mxu0 %v3360_v9  ;;  %2255 = vmatpush1.bf16.msra.mxu1 %v3363_v10  ;;  %v3442_v9 = vld [vmem:[#allocation8 + $0x28] sm:$0xff]  }
 0x26e   :  { %2170 = vmatprep.subr.bf16.mxu0 %v3368_v11  ;;  %2256 = vmatprep.subr.bf16.mxu1 %v3371_v12  ;;  %v3443_v10 = vld [vmem:[#allocation8 + $0xa8] sm:$0xff]   ;;  %v3444_v11 = vld [vmem:[#allocation8 + $0x70] sm:$0xff]  }
 0x26f   :  { %v3445_v12 = vld [vmem:[#allocation8 + $0xf0] sm:$0xff]  }
 0x271   :  { %2171 = vmatpush1.bf16.msra.mxu0 %v3366_v61  ;;  %2257 = vmatpush1.bf16.msra.mxu1 %v3369_v13  ;;  %v3446_v61 = vld [vmem:[#allocation8 + $0x30] sm:$0xff]  }
 0x272   :  { %2172 = vmatprep.subr.bf16.mxu0 %v3374_v15  ;;  %2258 = vmatprep.subr.bf16.mxu1 %v3377_v17  ;;  %v3447_v13 = vld [vmem:[#allocation8 + $0xb0] sm:$0xff]   ;;  %v3448_v15 = vld [vmem:[#allocation8 + $0x78] sm:$0xff]  }
 0x273   :  { %v3449_v17 = vld [vmem:[#allocation8 + $0xf8] sm:$0xff]  }
 0x275   :  { %2173 = vmatpush1.bf16.msra.mxu0 %v3372_v19  ;;  %2259 = vmatpush1.bf16.msra.mxu1 %v3375_v21  ;;  %v3450_v19 = vld [vmem:[#allocation8 + $0x38] sm:$0xff]  }
 0x276   :  { %2174 = vmatprep.subr.bf16.mxu0 %v3380_v22  ;;  %2260 = vmatprep.subr.bf16.mxu1 %v3383_v23  ;;  %v3451_v21 = vld [vmem:[#allocation8 + $0xb8] sm:$0xff]  }
 0x277   :  { %v355_v22 = vld [vmem:[%s3778_s6] sm:$0xf] }
 0x278   :  { %v1456_v23 = vrot.slane %v355_v22, %v3717_v14 }
 0x279   :  { %2175 = vmatpush1.bf16.msra.mxu0 %v3378_v24  ;;  %2261 = vmatpush1.bf16.msra.mxu1 %v3381_v25  ;;  %v1464_v24 = vrot.slane %v355_v22, %v3725_v18  ;;  %v1460_v25 = vrot.slane %v355_v22, %v3722_v16 }
 0x27a   :  { %2176 = vmatprep.subr.bf16.mxu0 %v3386_v26  ;;  %2262 = vmatprep.subr.bf16.mxu1 %v3389_v27  ;;  %v1468_v26 = vrot.slane %v355_v22, %v3728_v20 }
 0x27d   :  { %2177 = vmatpush1.bf16.msra.mxu0 %v3384_v28  ;;  %2263 = vmatpush1.bf16.msra.mxu1 %v3387_v29 }
 0x27e   :  { %2178 = vmatprep.subr.bf16.mxu0 %v3392_v30  ;;  %2264 = vmatprep.subr.bf16.mxu1 %v3395_v31 }
 0x281   :  { %2179 = vmatpush1.bf16.msra.mxu0 %v3390_v32  ;;  %2265 = vmatpush1.bf16.msra.mxu1 %v3393_v33 }
 0x282   :  { %2180 = vmatprep.subr.bf16.mxu0 %v3398_v34  ;;  %2266 = vmatprep.subr.bf16.mxu1 %v3401_v35 }
 0x285   :  { %2181 = vmatpush1.bf16.msra.mxu0 %v3396_v36  ;;  %2267 = vmatpush1.bf16.msra.mxu1 %v3399_v37 }
 0x286   :  { %2182 = vmatprep.subr.bf16.mxu0 %v3404_v38  ;;  %2268 = vmatprep.subr.bf16.mxu1 %v3407_v39 }
 0x289   :  { %2183 = vmatpush1.bf16.msra.mxu0 %v3402_v40  ;;  %2269 = vmatpush1.bf16.msra.mxu1 %v3405_v41 }
 0x28a   :  { %2184 = vmatprep.subr.bf16.mxu0 %v3410_v42  ;;  %2270 = vmatprep.subr.bf16.mxu1 %v3413_v43 }
 0x28d   :  { %2185 = vmatpush1.bf16.msra.mxu0 %v3408_v44  ;;  %2271 = vmatpush1.bf16.msra.mxu1 %v3411_v46 }
 0x28e   :  { %2186 = vmatprep.subr.bf16.mxu0 %v3416_v47  ;;  %2272 = vmatprep.subr.bf16.mxu1 %v3419_v48 }
 0x291   :  { %2187 = vmatpush1.bf16.msra.mxu0 %v3414_v49  ;;  %2273 = vmatpush1.bf16.msra.mxu1 %v3417_v50 }
 0x292   :  { %2937 = vmatprep.subr.bf16.mxu0 %v3420_v51  ;;  %2959 = vmatprep.subr.bf16.mxu1 %v3421_v52 }
 0x294   :  { %2189 = vmatmul.mubr.bf16.vlgmr.msra.gmra.mrb[8].mxu0 %v3743_v45  ;;  %2275 = vmatmul.mubr.bf16.vlgmr.msra.gmra.mrb[8].mxu1 %v3743_v45  ;;  %v3435_v45 = vld [vmem:[#allocation8 + $0x98] sm:$0xff]  }
 0x295   :  { %2938 = vmatpush3.bf16.msra.mxu0 %v3422_v53  ;;  %2960 = vmatpush3.bf16.msra.mxu1 %v3423_v54 }
 0x296   :  { %2939 = vmatprep.subr.bf16.mxu0 %v3424_v55  ;;  %2961 = vmatprep.subr.bf16.mxu1 %v3425_v56 }
 0x299   :  { %2940 = vmatpush3.bf16.msra.mxu0 %v3426_v57  ;;  %2962 = vmatpush3.bf16.msra.mxu1 %v3427_v58 }
 0x29a   :  { %2941 = vmatprep.subr.bf16.mxu0 %v3428_v59  ;;  %2963 = vmatprep.subr.bf16.mxu1 %v3429_v60 }
 0x29d   :  { %2942 = vmatpush3.bf16.msra.mxu0 %v3430_v62  ;;  %2964 = vmatpush3.bf16.msra.mxu1 %v3431_v63  ;;  %v2893_v63 = vld [vmem:[%s3780_s8] ss:$0 sm:$0xff]  ;;  %s3587_s8 = smov [#allocation10]  }
 0x29e   :  { %2943 = vmatprep.subr.bf16.mxu0 %v3432_v0  ;;  %2965 = vmatprep.subr.bf16.mxu1 %v3433_v1  ;;  %s2612_s23 = sshll.u32 %s3587_s8, 4  ;;  %s2613_s23 = int_to_ptr.vmem [resolvable:$true] %s2612_s23 }
 0x29f   :  { %s3548_s24 = scalar_lea.vmem %s2613_s23, 128  ;;  %p3553_p5 = scmp.lt.s32.totalorder %s2613_s23, %s2613_s23 }
 0x2a0   :  { %p3549_p4 = scmp.ne.s32.totalorder %s2613_s23, %s3548_s24  ;;  %p3554_p6 = scmp.lt.s32.totalorder %s3548_s24, %s3548_s24 }
 0x2a1   :  { %2944 = vmatpush3.bf16.msra.mxu0 %v3434_v2  ;;  %2966 = vmatpush3.bf16.msra.mxu1 %v3435_v45 }
 0x2a2   :  { %2945 = vmatprep.subr.bf16.mxu0 %v3436_v3  ;;  %2967 = vmatprep.subr.bf16.mxu1 %v3437_v4  ;;  %p3555_p7 = por %p3554_p6, %p3553_p5 }
 0x2a4   :  { %p3556_p8 = pnand %p3555_p7, %p3549_p4 }
 0x2a5   :  { %2946 = vmatpush3.bf16.msra.mxu0 %v3438_v5  ;;  %2968 = vmatpush3.bf16.msra.mxu1 %v3439_v6 }
 0x2a6   :  { %2947 = vmatprep.subr.bf16.mxu0 %v3440_v7  ;;  %2969 = vmatprep.subr.bf16.mxu1 %v3441_v8 }
 0x2a9   :  { %2948 = vmatpush3.bf16.msra.mxu0 %v3442_v9  ;;  %2970 = vmatpush3.bf16.msra.mxu1 %v3443_v10 }
 0x2aa   :  { %2949 = vmatprep.subr.bf16.mxu0 %v3444_v11  ;;  %2971 = vmatprep.subr.bf16.mxu1 %v3445_v12 }
 0x2ad   :  { %2950 = vmatpush3.bf16.msra.mxu0 %v3446_v61  ;;  %2972 = vmatpush3.bf16.msra.mxu1 %v3447_v13 }
 0x2ae   :  { %2951 = vmatprep.subr.bf16.mxu0 %v3448_v15  ;;  %2973 = vmatprep.subr.bf16.mxu1 %v3449_v17 }
 0x2b1   :  { %2952 = vmatpush3.bf16.msra.mxu0 %v3450_v19  ;;  %2974 = vmatpush3.bf16.msra.mxu1 %v3451_v21 }
 0x367   :  { %v2190_v27 = vpop.f32.mrb[8].mxu0  ;;  %v2276_v28 = vpop.f32.mrb[8].mxu1 }
 0x368   :  { %v2989_v29 = vadd.f32 %v2190_v27, %v1456_v23  ;;  %v2993_v30 = vadd.f32 %v2276_v28, %v1464_v24  ;;  %v2192_v31 = vpop.f32.mrb[9].mxu0  ;;  %v2278_v32 = vpop.f32.mrb[9].mxu1 }
 0x369   :  { %v2990_v33 = vadd.f32 %v2192_v31, %v1460_v25  ;;  %v2994_v34 = vadd.f32 %v2278_v32, %v1468_v26  ;;  %v2194_v35 = vpop.f32.mrb[10].mxu0  ;;  %v2280_v36 = vpop.f32.mrb[10].mxu1 }
 0x36a   :  { %v2285_v37 = vmul.f32 0.01, %v2989_v29  ;;  %v2287_v38 = vmul.f32 0.01, %v2993_v30  ;;  %v2991_v39 = vadd.f32 %v2194_v35, %v1456_v23  ;;  %v2995_v14 = vadd.f32 %v2280_v36, %v1464_v24  ;;  %v2196_v40 = vpop.f32.mrb[11].mxu0  ;;  %v2282_v18 = vpop.f32.mrb[11].mxu1 }
 0x36b   :  { %v2286_v41 = vmul.f32 0.01, %v2990_v33  ;;  %v2288_v16 = vmul.f32 0.01, %v2994_v34  ;;  %v2992_v42 = vadd.f32 %v2196_v40, %v1460_v25  ;;  %v2996_v20 = vadd.f32 %v2282_v18, %v1468_v26 }
 0x36c   :  { %v2289_v43 = vmul.f32 0.01, %v2991_v39  ;;  %v2291_v44 = vmul.f32 0.01, %v2995_v14  ;;  %v2293_v48 = vmax.f32 %v2989_v29, %v2285_v37  ;;  %v2295_v49 = vmax.f32 %v2993_v30, %v2287_v38 }
 0x36d   :  { %v2290_v46 = vmul.f32 0.01, %v2992_v42  ;;  %v2292_v47 = vmul.f32 0.01, %v2996_v20  ;;  %v2294_v52 = vmax.f32 %v2990_v33, %v2286_v41  ;;  %v2296_v53 = vmax.f32 %v2994_v34, %v2288_v16 }
 0x36e   :  { %v2297_v50 = vmax.f32 %v2991_v39, %v2289_v43  ;;  %v2299_v51 = vmax.f32 %v2995_v14, %v2291_v44 }
 0x36f   :  { %v2298_v54 = vmax.f32 %v2992_v42, %v2290_v46  ;;  %v2300_v55 = vmax.f32 %v2996_v20, %v2292_v47 }
 0x370   :  { %v2301_v56 = vpack.c.bf16 %v2297_v50, %v2293_v48  ;;  %v2303_v57 = vpack.c.bf16 %v2299_v51, %v2295_v49 }
 0x371   :  { %v2302_v58 = vpack.c.bf16 %v2298_v54, %v2294_v52  ;;  %v2304_v59 = vpack.c.bf16 %v2300_v55, %v2296_v53 }
 0x373   :  { %2535 = vmatprep.mubr.bf16.mxu0 %v2302_v58  ;;  %2576 = vmatprep.mubr.bf16.mxu1 %v2304_v59 }
 0x374   :  { %2536 = vmatmul.mubr.bf16.vlgmr.msra.gmra.mrb[12].mxu0 %v2301_v56  ;;  %2577 = vmatmul.mubr.bf16.vlgmr.msra.gmra.mrb[12].mxu1 %v2303_v57 }
 0x447   :  { %v2953_v60 = vpop.f32.mrb[12].mxu0  ;;  %v2975_v62 = vpop.f32.mrb[12].mxu1 }
 0x448   :  { %v2954_v0 = vpop.f32.mrb[13].mxu0  ;;  %v2976_v1 = vpop.f32.mrb[13].mxu1 }
 0x449   :  { %v2955_v2 = vadd.f32 %v2954_v0, %v2953_v60  ;;  %v2977_v45 = vadd.f32 %v2976_v1, %v2975_v62  ;;  %v2956_v3 = vpop.f32.mrb[14].mxu0  ;;  %v2978_v4 = vpop.f32.mrb[14].mxu1 }
 0x44a   :  { %v2957_v5 = vpop.f32.mrb[15].mxu0  ;;  %v2979_v6 = vpop.f32.mrb[15].mxu1 }
 0x44b   :  { %v2538_v7 = vadd.f32 %v2955_v2, %v2893_v63  ;;  %v2958_v8 = vadd.f32 %v2957_v5, %v2956_v3  ;;  %v2980_v9 = vadd.f32 %v2979_v6, %v2978_v4 }
 0x44d   :  { %v2579_v10 = vadd.f32 %v2977_v45, %v2538_v7  ;;  %v2541_v11 = vadd.f32 %v2958_v8, %v2893_v63 }
 0x44f   :  { %v2926_v12 = vmul.f32 -1.442695, %v2579_v10  ;;  %v2582_v61 = vadd.f32 %v2980_v9, %v2541_v11 }
 0x451   :  { %3452 = vpow2.f32 %v2926_v12  ;;  %v2927_v13 = vmul.f32 -1.442695, %v2582_v61 }
 0x453   :  { %3454 = vpow2.f32 %v2927_v13 }
 0x45b   :  { %v3453_v15 = vpop.eup %3452 }
 0x45c   :  { %v2591_v17 = vadd.f32 1.0, %v3453_v15 }
 0x45d   :  { %v3455_v19 = vpop.eup %3454 }
 0x45e   :  { %v2592_v21 = vadd.f32 1.0, %v3455_v19  ;;  %3456 = vrcp.f32 %v2591_v17 }
 0x460   :  { %3458 = vrcp.f32 %v2592_v21 }
 0x468   :  { %v3457_v22 = vpop.eup %3456 }
 0x46a   :  { %v3459_v23 = vpop.eup %3458 }
 0x46b   :  { %v2935_v24 = vpack.c.bf16 %v3459_v23, %v3457_v22 }
 0x46d   :  { %2936 = vst [vmem:[#allocation10] sm:$0xff] %v2935_v24  }
 0x46e   :  { %3559 = shalt.err (!%p3556_p8)
}
 0x46f   :  { %s3560_s1 = scalar_lea.hbm %s3781_s9, 128 }
 0x470   :  { %p3561_p9 = scmp.ne.s32.totalorder %s3781_s9, %s3560_s1  ;;  %p3564_p10 = scmp.lt.u32.totalorder %s3560_s1, %s3781_s9 }
 0x472   :  { %p3566_p11 = pnand %p3564_p10, %p3561_p9 }
 0x474   :  { %3569 = shalt.err (!%p3566_p11)
}
 0x475   :  { %2618 = dma.vmem_to_hbm [thread:$0]  %s2613_s23, 128, %s3781_s9, [#allocation4], %s3584_s5, %s3584_s5, %s3585_s21  }
 0x476   :  { %3576 = dma.done.wait [#allocation4], 128  }
 0x477   :  { %3577 = vsyncadd [#allocation4], 4294967168 }
 0x478   :  { %2622 = vsyncpa [#allocation3], 1 }
 0x479   :  { %2623 = vsyncpa [#allocation6], 1 }
 0x47a   :  { %2624 = vsyncpa [#allocation9], 1 }
 0x47b   :  { %2625 = vsyncpa [#allocation4], 1 }

</bundles_post_ra>
